<compile_context>
chip_gen: v7x
topology: tpu7x:2x2x1
jax: 0.10.0
libtpu: 0.0.40
codegen_flags: <defaults>
</compile_context>

<pallas_src>
import math
from functools import partial

import jax
import jax.numpy as jnp
from jax import lax
from jax.experimental import pallas as pl
from jax.experimental.pallas import tpu as pltpu


def _flash_self_attention_kernel(xq_ref, xkv_ref, wq_ref, wkv_ref, wproj_ref,
                                 bproj_ref, o_ref,
                                 q_s, m_s, l_s, acc_s, *, num_heads: int):
    """Grid = (batch, q_block, kv_block); kv_block is the innermost (arbitrary) axis."""
    H = num_heads
    _, tq, C = xq_ref.shape
    tkv = xkv_ref.shape[1]
    D = C // H
    ki = pl.program_id(2)
    n_kv = pl.num_programs(2)

    @pl.when(ki == 0)
    def _init():
        # Lane-dense q projection (K = C, N = C); D**-0.5 already folded into wq.
        q = jnp.dot(xq_ref[0], wq_ref[...], preferred_element_type=jnp.float32)
        # 'l (h d) -> h l d' for the head-batched attention matmuls.
        q_s[...] = jnp.transpose(q.reshape(tq, H, D), (1, 0, 2)).astype(jnp.bfloat16)
        m_s[...] = jnp.full(m_s.shape, -jnp.inf, dtype=m_s.dtype)
        l_s[...] = jnp.zeros(l_s.shape, dtype=l_s.dtype)
        acc_s[...] = jnp.zeros(acc_s.shape, dtype=acc_s.dtype)

    # Lane-dense k/v projection for this KV block (K = C, N = 2C).
    kv = jnp.dot(xkv_ref[0], wkv_ref[...], preferred_element_type=jnp.float32)
    k = jnp.transpose(kv[:, :C].reshape(tkv, H, D), (1, 0, 2)).astype(jnp.bfloat16)
    v = jnp.transpose(kv[:, C:].reshape(tkv, H, D), (1, 0, 2)).astype(jnp.bfloat16)

    # Scores for all heads at once: (H, tq, D) x (H, tkv, D) -> (H, tq, tkv), f32 acc.
    s = lax.dot_general(q_s[...], k,
                        dimension_numbers=(((2,), (2,)), ((0,), (0,))),
                        preferred_element_type=jnp.float32)

    # Online (flash) softmax update; statistics kept in f32 (v5e-friendly).
    m_prev = m_s[...]                                       # (H, tq)
    m_new = jnp.maximum(m_prev, jnp.max(s, axis=-1))        # (H, tq)
    alpha = jnp.exp(m_prev - m_new)                         # (H, tq)
    p = jnp.exp(s - m_new[..., None])                       # (H, tq, tkv)
    l_s[...] = alpha * l_s[...] + jnp.sum(p, axis=-1)
    pv = lax.dot_general(p.astype(jnp.bfloat16), v,
                         dimension_numbers=(((2,), (1,)), ((0,), (0,))),
                         preferred_element_type=jnp.float32)        # (H, tq, D)
    acc_s[...] = alpha[..., None] * acc_s[...] + pv
    m_s[...] = m_new

    @pl.when(ki == n_kv - 1)
    def _finalize():
        # Exact reciprocal on the tiny (H, tq) denominator.
        o = acc_s[...] * pl.reciprocal(l_s[...])[..., None]          # (H, tq, D)
        # 'h l d -> l (h d)', then ONE lane-dense output projection (K = C) + bias.
        o_flat = jnp.transpose(o, (1, 0, 2)).reshape(tq, C).astype(jnp.bfloat16)
        y = jnp.dot(o_flat, wproj_ref[...], preferred_element_type=jnp.float32)
        o_ref[0] = (y + bproj_ref[...]).astype(o_ref.dtype)


def _pick_tile(L: int) -> int:
    # Largest MXU-friendly block dividing L (256-multiples suit v6e/v7x, 128 is native
    # on v5e); fall back to the whole sequence for small / ragged L.
    for t in (512, 256, 128):
        if L >= t and L % t == 0:
            return t
    return L


def _vmem_capacity_bytes() -> int:
    try:
        return int(pltpu.get_tpu_info().vmem_capacity_bytes)
    except Exception:
        return 64 * 2 ** 20  # conservative fallback: v7x per-TensorCore VMEM


def _vmem_bytes_estimate(tq: int, tkv: int, C: int, H: int) -> int:
    D = C // H
    bf, f32 = 2, 4
    weights = C * C * bf + C * 2 * C * bf + C * C * bf + C * f32            # single-buffered
    io = 2 * tq * C * bf + 2 * tkv * C * bf + 2 * tq * C * f32              # double-buffered blocks
    scratch = H * tq * D * (bf + f32) + 2 * H * max(tq, 128) * f32          # q, acc, m, l
    temps = (tkv * 2 * C * f32 + 2 * tkv * C * bf                           # kv proj, k, v
             + H * tq * tkv * (f32 + f32 + bf)                              # s, p (f32 + bf16)
             + H * tq * D * f32 + tq * C * (f32 + bf) + tq * C * f32)       # pv, o_flat, y
    return weights + io + scratch + temps


def self_attention(x, w_qkv, w_proj, b_proj, *, num_heads: int):
    """x: [B, L, C]; w_qkv: [C, 3C] (no bias, '(K H D)' column order); w_proj: [C, C]."""
    B, L, C = x.shape
    H = num_heads
    assert C % H == 0
    D = C // H
    scale = D ** (-0.5)

    # One-time weight prep in plain XLA: first C columns of w_qkv are q (all heads),
    # next C are k, last C are v.  Fold the softmax scale into the q weights and cast
    # MXU operands to bf16.
    wq = (w_qkv[:, :C] * scale).astype(jnp.bfloat16)          # (C, C)
    wkv = w_qkv[:, C:].astype(jnp.bfloat16)                   # (C, 2C)
    wp = w_proj.astype(jnp.bfloat16)                          # (C, C)
    bp = b_proj.reshape(1, C).astype(jnp.float32)             # (1, C)
    x_bf = x.astype(jnp.bfloat16)

    tq = _pick_tile(L)
    tkv = _pick_tile(L)
    grid = (B, L // tq, L // tkv)

    est = _vmem_bytes_estimate(tq, tkv, C, H)
    cap = _vmem_capacity_bytes()
    vmem_limit = int(min(int(0.85 * cap), max(32 * 2 ** 20, int(1.5 * est))))

    def weight_spec(shape):
        # Grid-invariant operands: single-buffer to reclaim VMEM (matters on v7x).
        return pl.BlockSpec(shape, lambda b, qi, ki: (0,) * len(shape),
                            pipeline_mode=pl.Buffered(1))

    kernel = partial(_flash_self_attention_kernel, num_heads=H)

    return pl.pallas_call(
        kernel,
        out_shape=jax.ShapeDtypeStruct((B, L, C), x.dtype),
        grid_spec=pltpu.PrefetchScalarGridSpec(
            num_scalar_prefetch=0,
            grid=grid,
            in_specs=[
                pl.BlockSpec((1, tq, C), lambda b, qi, ki: (b, qi, 0)),   # x (query rows)
                pl.BlockSpec((1, tkv, C), lambda b, qi, ki: (b, ki, 0)),  # x (kv rows)
                weight_spec((C, C)),        # wq (scale folded in)
                weight_spec((C, 2 * C)),    # wkv
                weight_spec((C, C)),        # wproj
                weight_spec((1, C)),        # bproj
            ],
            out_specs=pl.BlockSpec((1, tq, C), lambda b, qi, ki: (b, qi, 0)),
            scratch_shapes=[
                pltpu.VMEM((H, tq, D), jnp.bfloat16),   # q heads for the current q block
                pltpu.VMEM((H, tq), jnp.float32),       # running row max
                pltpu.VMEM((H, tq), jnp.float32),       # running denominator
                pltpu.VMEM((H, tq, D), jnp.float32),    # output accumulator
            ],
        ),
        compiler_params=pltpu.CompilerParams(
            dimension_semantics=("parallel", "parallel", "arbitrary"),
            vmem_limit_bytes=vmem_limit),
    )(x_bf, x_bf, wq, wkv, wp, bp)


def self_attention_ref(x, w_qkv, w_proj, b_proj, *, num_heads: int):
    """Pure-JAX f32 reference mirroring the PyTorch forward ('math' mode, drop=0)."""
    B, L, C = x.shape
    H = num_heads
    D = C // H
    scale = D ** (-0.5)
    qkv = x @ w_qkv                                            # (B, L, 3C)
    qkv = qkv.reshape(B, L, 3, H, D).transpose(2, 0, 3, 1, 4)  # (3, B, H, L, D)
    q, k, v = qkv[0], qkv[1], qkv[2]
    attn = jnp.einsum('bhld,bhmd->bhlm', q, k) * scale
    attn = jax.nn.softmax(attn, axis=-1)
    out = jnp.einsum('bhlm,bhmd->bhld', attn, v)               # (B, H, L, D)
    out = out.transpose(0, 2, 1, 3).reshape(B, L, C)
    return out @ w_proj + b_proj


if __name__ == "__main__":
    # Small shapes consistent with the module: dim=32, num_heads=8 -> head_dim=4.
    B, L, C = 2, 8, 32
    num_heads = 8

    key = jax.random.PRNGKey(0)
    kx, kq, kp, kb = jax.random.split(key, 4)

    x = jax.random.normal(kx, (B, L, C), dtype=jnp.float32)
    # Synthetic params (nn.Linear: qkv C->3C no bias, proj C->C with bias), stored
    # input-major so y = x @ W (+ b).
    w_qkv = jax.random.normal(kq, (C, 3 * C), dtype=jnp.float32) * (1.0 / math.sqrt(C))
    w_proj = jax.random.normal(kp, (C, C), dtype=jnp.float32) * (1.0 / math.sqrt(C))
    b_proj = jax.random.normal(kb, (C,), dtype=jnp.float32) * 0.01

    out = self_attention(x, w_qkv, w_proj, b_proj, num_heads=num_heads)
    out = jax.block_until_ready(out)

    ref = self_attention_ref(x, w_qkv, w_proj, b_proj, num_heads=num_heads)
    assert out.shape == (B, L, C)
    # bf16 MXU operands (f32 accumulation, f32 softmax stats, exact reciprocal).
    assert jnp.allclose(out, ref, atol=5e-2, rtol=5e-2), "mismatch vs reference"

    print("KERNEL_OK")
</pallas_src>

<mosaic_0001>
module attributes {stable_mosaic.version = 11 : i64} {
  func.func @_flash_self_attention_kernel(%arg0: i32, %arg1: i32, %arg2: i32, %arg3: memref<1x8x32xbf16, #tpu.memory_space<vmem>>, %arg4: memref<1x8x32xbf16, #tpu.memory_space<vmem>>, %arg5: memref<32x32xbf16, #tpu.memory_space<vmem>>, %arg6: memref<32x64xbf16, #tpu.memory_space<vmem>>, %arg7: memref<32x32xbf16, #tpu.memory_space<vmem>>, %arg8: memref<1x32xf32, #tpu.memory_space<vmem>>, %arg9: memref<1x8x32xf32, #tpu.memory_space<vmem>>, %arg10: memref<8x8x4xbf16, #tpu.memory_space<vmem>>, %arg11: memref<8x8xf32, #tpu.memory_space<vmem>>, %arg12: memref<8x8xf32, #tpu.memory_space<vmem>>, %arg13: memref<8x8x4xf32, #tpu.memory_space<vmem>>) attributes {dimension_semantics = [#tpu.dimension_semantics<parallel>, #tpu.dimension_semantics<parallel>, #tpu.dimension_semantics<arbitrary>], iteration_bounds = array<i64: 2, 1, 1>, scalar_prefetch = 0 : i64, scratch_operands = 4 : i64, tpu.core_type = #tpu.core_type<tc>, window_params = [{transform_indices = @transform_0, window_bounds = array<i64: 1, 8, 32>}, {transform_indices = @transform_1, window_bounds = array<i64: 1, 8, 32>}, {pipeline_mode = #tpu.pipeline_mode<synchronous>, transform_indices = @transform_2, window_bounds = array<i64: 32, 32>}, {pipeline_mode = #tpu.pipeline_mode<synchronous>, transform_indices = @transform_3, window_bounds = array<i64: 32, 64>}, {pipeline_mode = #tpu.pipeline_mode<synchronous>, transform_indices = @transform_4, window_bounds = array<i64: 32, 32>}, {pipeline_mode = #tpu.pipeline_mode<synchronous>, transform_indices = @transform_5, window_bounds = array<i64: 1, 32>}, {transform_indices = @transform_6, window_bounds = array<i64: 1, 8, 32>}]} {
    %c0_i32 = arith.constant 0 : i32
    %0 = arith.cmpi eq, %arg2, %c0_i32 : i32
    %1 = arith.extui %0 : i1 to i32
    %c0_i32_0 = arith.constant 0 : i32
    %2 = arith.cmpi ne, %1, %c0_i32_0 : i32
    scf.if %2 {
      %c0_28 = arith.constant 0 : index
      %c0_29 = arith.constant 0 : index
      %c0_30 = arith.constant 0 : index
      %43 = vector.load %arg3[%c0_28, %c0_29, %c0_30] : memref<1x8x32xbf16, #tpu.memory_space<vmem>>, vector<1x8x32xbf16>
      %44 = vector.shape_cast %43 : vector<1x8x32xbf16> to vector<8x32xbf16>
      %c0_31 = arith.constant 0 : index
      %c0_32 = arith.constant 0 : index
      %45 = vector.load %arg5[%c0_31, %c0_32] : memref<32x32xbf16, #tpu.memory_space<vmem>>, vector<32x32xbf16>
      %cst_33 = arith.constant dense<0.000000e+00> : vector<8x32xf32>
      %46 = tpu.matmul %44, %45, %cst_33 {dimension_numbers = #tpu.dot_dimension_numbers<[1], [0], [0], [1], [0, 0, 1, 1], [], []>} : vector<8x32xbf16>, vector<32x32xbf16>, vector<8x32xf32> -> vector<8x32xf32>
      %47 = vector.shape_cast %46 : vector<8x32xf32> to vector<8x8x4xf32>
      %48 = tpu.transpose %47, [1, 0, 2] : vector<8x8x4xf32> -> vector<8x8x4xf32>
      %49 = arith.truncf %48 : vector<8x8x4xf32> to vector<8x8x4xbf16>
      %c0_34 = arith.constant 0 : index
      %c0_35 = arith.constant 0 : index
      %c0_36 = arith.constant 0 : index
      %50 = vector.load %arg10[%c0_34, %c0_35, %c0_36] : memref<8x8x4xbf16, #tpu.memory_space<vmem>>, vector<8x8x4xbf16>
      tpu.vector_store %arg10[%c0_34, %c0_35, %c0_36], %49 {strides = array<i32>} : memref<8x8x4xbf16, #tpu.memory_space<vmem>>, vector<8x8x4xbf16>,
      %cst_37 = arith.constant 0xFF800000 : f32
      %51 = vector.broadcast %cst_37 : f32 to vector<8x8xf32>
      %c0_38 = arith.constant 0 : index
      %c0_39 = arith.constant 0 : index
      %52 = vector.load %arg11[%c0_38, %c0_39] : memref<8x8xf32, #tpu.memory_space<vmem>>, vector<8x8xf32>
      tpu.vector_store %arg11[%c0_38, %c0_39], %51 {strides = array<i32>} : memref<8x8xf32, #tpu.memory_space<vmem>>, vector<8x8xf32>,
      %cst_40 = arith.constant 0.000000e+00 : f32
      %53 = vector.broadcast %cst_40 : f32 to vector<8x8xf32>
      %c0_41 = arith.constant 0 : index
      %c0_42 = arith.constant 0 : index
      %54 = vector.load %arg12[%c0_41, %c0_42] : memref<8x8xf32, #tpu.memory_space<vmem>>, vector<8x8xf32>
      tpu.vector_store %arg12[%c0_41, %c0_42], %53 {strides = array<i32>} : memref<8x8xf32, #tpu.memory_space<vmem>>, vector<8x8xf32>,
      %cst_43 = arith.constant 0.000000e+00 : f32
      %55 = vector.broadcast %cst_43 : f32 to vector<8x8x4xf32>
      %c0_44 = arith.constant 0 : index
      %c0_45 = arith.constant 0 : index
      %c0_46 = arith.constant 0 : index
      %56 = vector.load %arg13[%c0_44, %c0_45, %c0_46] : memref<8x8x4xf32, #tpu.memory_space<vmem>>, vector<8x8x4xf32>
      tpu.vector_store %arg13[%c0_44, %c0_45, %c0_46], %55 {strides = array<i32>} : memref<8x8x4xf32, #tpu.memory_space<vmem>>, vector<8x8x4xf32>,
    } else {
    }
    %c0 = arith.constant 0 : index
    %c0_1 = arith.constant 0 : index
    %c0_2 = arith.constant 0 : index
    %3 = vector.load %arg4[%c0, %c0_1, %c0_2] : memref<1x8x32xbf16, #tpu.memory_space<vmem>>, vector<1x8x32xbf16>
    %4 = vector.shape_cast %3 : vector<1x8x32xbf16> to vector<8x32xbf16>
    %c0_3 = arith.constant 0 : index
    %c0_4 = arith.constant 0 : index
    %5 = vector.load %arg6[%c0_3, %c0_4] : memref<32x64xbf16, #tpu.memory_space<vmem>>, vector<32x64xbf16>
    %cst = arith.constant dense<0.000000e+00> : vector<8x64xf32>
    %6 = tpu.matmul %4, %5, %cst {dimension_numbers = #tpu.dot_dimension_numbers<[1], [0], [0], [1], [0, 0, 1, 1], [], []>} : vector<8x32xbf16>, vector<32x64xbf16>, vector<8x64xf32> -> vector<8x64xf32>
    %7 = vector.extract_strided_slice %6 {offsets = [0, 0], sizes = [8, 32], strides = [1, 1]} : vector<8x64xf32> to vector<8x32xf32>
    %8 = vector.shape_cast %7 : vector<8x32xf32> to vector<8x8x4xf32>
    %9 = tpu.transpose %8, [1, 0, 2] : vector<8x8x4xf32> -> vector<8x8x4xf32>
    %10 = arith.truncf %9 : vector<8x8x4xf32> to vector<8x8x4xbf16>
    %11 = vector.extract_strided_slice %6 {offsets = [0, 32], sizes = [8, 32], strides = [1, 1]} : vector<8x64xf32> to vector<8x32xf32>
    %12 = vector.shape_cast %11 : vector<8x32xf32> to vector<8x8x4xf32>
    %13 = tpu.transpose %12, [1, 0, 2] : vector<8x8x4xf32> -> vector<8x8x4xf32>
    %14 = arith.truncf %13 : vector<8x8x4xf32> to vector<8x8x4xbf16>
    %c0_5 = arith.constant 0 : index
    %c0_6 = arith.constant 0 : index
    %c0_7 = arith.constant 0 : index
    %15 = vector.load %arg10[%c0_5, %c0_6, %c0_7] : memref<8x8x4xbf16, #tpu.memory_space<vmem>>, vector<8x8x4xbf16>
    %cst_8 = arith.constant dense<0.000000e+00> : vector<8x8x8xf32>
    %16 = tpu.matmul %15, %10, %cst_8 {dimension_numbers = #tpu.dot_dimension_numbers<[2], [2], [1], [1], [0, 0, 0, 1, 1, 1], [0], [0]>} : vector<8x8x4xbf16>, vector<8x8x4xbf16>, vector<8x8x8xf32> -> vector<8x8x8xf32>
    %c0_9 = arith.constant 0 : index
    %c0_10 = arith.constant 0 : index
    %17 = vector.load %arg11[%c0_9, %c0_10] : memref<8x8xf32, #tpu.memory_space<vmem>>, vector<8x8xf32>
    %cst_11 = arith.constant dense<0xFF800000> : vector<8x8xf32>
    %18 = vector.multi_reduction <maximumf>, %16, %cst_11 [2] : vector<8x8x8xf32> to vector<8x8xf32>
    %19 = arith.maximumf %17, %18 : vector<8x8xf32>
    %20 = arith.subf %17, %19 : vector<8x8xf32>
    %21 = math.exp %20 : vector<8x8xf32>
    %22 = vector.shape_cast %19 : vector<8x8xf32> to vector<8x8x1xf32>
    %23 = vector.broadcast %22 : vector<8x8x1xf32> to vector<8x8x8xf32>
    %24 = arith.subf %16, %23 : vector<8x8x8xf32>
    %25 = math.exp %24 : vector<8x8x8xf32>
    %c0_12 = arith.constant 0 : index
    %c0_13 = arith.constant 0 : index
    %26 = vector.load %arg12[%c0_12, %c0_13] : memref<8x8xf32, #tpu.memory_space<vmem>>, vector<8x8xf32>
    %27 = arith.mulf %21, %26 : vector<8x8xf32>
    %cst_14 = arith.constant dense<0.000000e+00> : vector<8x8xf32>
    %28 = vector.multi_reduction <add>, %25, %cst_14 [2] : vector<8x8x8xf32> to vector<8x8xf32>
    %29 = arith.addf %27, %28 : vector<8x8xf32>
    %c0_15 = arith.constant 0 : index
    %c0_16 = arith.constant 0 : index
    %30 = vector.load %arg12[%c0_15, %c0_16] : memref<8x8xf32, #tpu.memory_space<vmem>>, vector<8x8xf32>
    tpu.vector_store %arg12[%c0_15, %c0_16], %29 {strides = array<i32>} : memref<8x8xf32, #tpu.memory_space<vmem>>, vector<8x8xf32>,
    %31 = arith.truncf %25 : vector<8x8x8xf32> to vector<8x8x8xbf16>
    %cst_17 = arith.constant dense<0.000000e+00> : vector<8x8x4xf32>
    %32 = tpu.matmul %31, %14, %cst_17 {dimension_numbers = #tpu.dot_dimension_numbers<[2], [1], [1], [2], [0, 0, 0, 1, 1, 2], [0], [0]>} : vector<8x8x8xbf16>, vector<8x8x4xbf16>, vector<8x8x4xf32> -> vector<8x8x4xf32>
    %33 = vector.shape_cast %21 : vector<8x8xf32> to vector<8x8x1xf32>
    %c0_18 = arith.constant 0 : index
    %c0_19 = arith.constant 0 : index
    %c0_20 = arith.constant 0 : index
    %34 = vector.load %arg13[%c0_18, %c0_19, %c0_20] : memref<8x8x4xf32, #tpu.memory_space<vmem>>, vector<8x8x4xf32>
    %35 = vector.broadcast %33 : vector<8x8x1xf32> to vector<8x8x4xf32>
    %36 = arith.mulf %35, %34 : vector<8x8x4xf32>
    %37 = arith.addf %36, %32 : vector<8x8x4xf32>
    %c0_21 = arith.constant 0 : index
    %c0_22 = arith.constant 0 : index
    %c0_23 = arith.constant 0 : index
    %38 = vector.load %arg13[%c0_21, %c0_22, %c0_23] : memref<8x8x4xf32, #tpu.memory_space<vmem>>, vector<8x8x4xf32>
    tpu.vector_store %arg13[%c0_21, %c0_22, %c0_23], %37 {strides = array<i32>} : memref<8x8x4xf32, #tpu.memory_space<vmem>>, vector<8x8x4xf32>,
    %c0_24 = arith.constant 0 : index
    %c0_25 = arith.constant 0 : index
    %39 = vector.load %arg11[%c0_24, %c0_25] : memref<8x8xf32, #tpu.memory_space<vmem>>, vector<8x8xf32>
    tpu.vector_store %arg11[%c0_24, %c0_25], %19 {strides = array<i32>} : memref<8x8xf32, #tpu.memory_space<vmem>>, vector<8x8xf32>,
    %c0_i32_26 = arith.constant 0 : i32
    %40 = arith.cmpi eq, %arg2, %c0_i32_26 : i32
    %41 = arith.extui %40 : i1 to i32
    %c0_i32_27 = arith.constant 0 : i32
    %42 = arith.cmpi ne, %41, %c0_i32_27 : i32
    scf.if %42 {
      %c0_28 = arith.constant 0 : index
      %c0_29 = arith.constant 0 : index
      %c0_30 = arith.constant 0 : index
      %43 = vector.load %arg13[%c0_28, %c0_29, %c0_30] : memref<8x8x4xf32, #tpu.memory_space<vmem>>, vector<8x8x4xf32>
      %c0_31 = arith.constant 0 : index
      %c0_32 = arith.constant 0 : index
      %44 = vector.load %arg12[%c0_31, %c0_32] : memref<8x8xf32, #tpu.memory_space<vmem>>, vector<8x8xf32>
      %45 = tpu.reciprocal %44 : vector<8x8xf32> -> vector<8x8xf32>
      %46 = vector.shape_cast %45 : vector<8x8xf32> to vector<8x8x1xf32>
      %47 = vector.broadcast %46 : vector<8x8x1xf32> to vector<8x8x4xf32>
      %48 = arith.mulf %43, %47 : vector<8x8x4xf32>
      %49 = tpu.transpose %48, [1, 0, 2] : vector<8x8x4xf32> -> vector<8x8x4xf32>
      %50 = vector.shape_cast %49 : vector<8x8x4xf32> to vector<8x32xf32>
      %51 = arith.truncf %50 : vector<8x32xf32> to vector<8x32xbf16>
      %c0_33 = arith.constant 0 : index
      %c0_34 = arith.constant 0 : index
      %52 = vector.load %arg7[%c0_33, %c0_34] : memref<32x32xbf16, #tpu.memory_space<vmem>>, vector<32x32xbf16>
      %cst_35 = arith.constant dense<0.000000e+00> : vector<8x32xf32>
      %53 = tpu.matmul %51, %52, %cst_35 {dimension_numbers = #tpu.dot_dimension_numbers<[1], [0], [0], [1], [0, 0, 1, 1], [], []>} : vector<8x32xbf16>, vector<32x32xbf16>, vector<8x32xf32> -> vector<8x32xf32>
      %c0_36 = arith.constant 0 : index
      %c0_37 = arith.constant 0 : index
      %54 = vector.load %arg8[%c0_36, %c0_37] : memref<1x32xf32, #tpu.memory_space<vmem>>, vector<1x32xf32>
      %55 = vector.broadcast %54 : vector<1x32xf32> to vector<8x32xf32>
      %56 = arith.addf %53, %55 : vector<8x32xf32>
      %c0_38 = arith.constant 0 : index
      %c0_39 = arith.constant 0 : index
      %c0_40 = arith.constant 0 : index
      %57 = vector.load %arg9[%c0_38, %c0_39, %c0_40] : memref<1x8x32xf32, #tpu.memory_space<vmem>>, vector<1x8x32xf32>
      %58 = vector.shape_cast %57 : vector<1x8x32xf32> to vector<8x32xf32>
      %59 = vector.shape_cast %56 : vector<8x32xf32> to vector<1x8x32xf32>
      tpu.vector_store %arg9[%c0_38, %c0_39, %c0_40], %59 {strides = array<i32>} : memref<1x8x32xf32, #tpu.memory_space<vmem>>, vector<1x8x32xf32>,
    } else {
    }
    return
  }
  func.func @transform_0(%arg0: i32, %arg1: i32, %arg2: i32) -> (i32, i32, i32) {
    %c0_i32 = arith.constant 0 : i32
    %c0_i32_0 = arith.constant 0 : i32
    return %arg0, %arg1, %c0_i32 : i32, i32, i32
  }
  func.func @transform_1(%arg0: i32, %arg1: i32, %arg2: i32) -> (i32, i32, i32) {
    %c0_i32 = arith.constant 0 : i32
    %c0_i32_0 = arith.constant 0 : i32
    return %arg0, %arg2, %c0_i32 : i32, i32, i32
  }
  func.func @transform_2(%arg0: i32, %arg1: i32, %arg2: i32) -> (i32, i32) {
    %c0_i32 = arith.constant 0 : i32
    %c0_i32_0 = arith.constant 0 : i32
    %c0_i32_1 = arith.constant 0 : i32
    return %c0_i32, %c0_i32_0 : i32, i32
  }
  func.func @transform_3(%arg0: i32, %arg1: i32, %arg2: i32) -> (i32, i32) {
    %c0_i32 = arith.constant 0 : i32
    %c0_i32_0 = arith.constant 0 : i32
    %c0_i32_1 = arith.constant 0 : i32
    return %c0_i32, %c0_i32_0 : i32, i32
  }
  func.func @transform_4(%arg0: i32, %arg1: i32, %arg2: i32) -> (i32, i32) {
    %c0_i32 = arith.constant 0 : i32
    %c0_i32_0 = arith.constant 0 : i32
    %c0_i32_1 = arith.constant 0 : i32
    return %c0_i32, %c0_i32_0 : i32, i32
  }
  func.func @transform_5(%arg0: i32, %arg1: i32, %arg2: i32) -> (i32, i32) {
    %c0_i32 = arith.constant 0 : i32
    %c0_i32_0 = arith.constant 0 : i32
    %c0_i32_1 = arith.constant 0 : i32
    return %c0_i32, %c0_i32_0 : i32, i32
  }
  func.func @transform_6(%arg0: i32, %arg1: i32, %arg2: i32) -> (i32, i32, i32) {
    %c0_i32 = arith.constant 0 : i32
    %c0_i32_0 = arith.constant 0 : i32
    return %arg0, %arg1, %c0_i32 : i32, i32, i32
  }
}

</mosaic_0001>

<bundles_post_ra>
// kernel: tpu_custom_call.1
= control target key start
LH: loop header
LB: loop body
LE: loop exit
PB: predicated region body
PF: predicated region fallthrough
CT: control target
= control target key end

     0   :  { %s4637_s0 = inlined_call_operand.hbm [shape: bf16[2,8,32], index: 0, kind: input, shape index: {}]   ;;  %s4638_s1 = inlined_call_operand.hbm [shape: bf16[2,8,32], index: 1, kind: input, shape index: {}]   ;;  %s4639_s2 = inlined_call_operand.hbm [shape: bf16[32,32], index: 2, kind: input, shape index: {}]   ;;  %s4640_s3 = inlined_call_operand.hbm [shape: bf16[32,64], index: 3, kind: input, shape index: {}]   ;;  %s4641_s4 = inlined_call_operand.hbm [shape: bf16[32,32], index: 4, kind: input, shape index: {}]   ;;  %s4642_s5 = inlined_call_operand.vmem [shape: f32[1,32], index: 5, kind: input, shape index: {}]   ;;  %s4643_s6 = inlined_call_operand.hbm [shape: f32[2,8,32], index: 6, kind: output, shape index: {}]  }
   0x1   :  { %4650 = sst [smem:[#allocation23_spill]] %s4639_s2 }
   0x2   :  { %4651 = sst [smem:[#allocation24_spill]] %s4640_s3 }
   0x3   :  { %4652 = sst [smem:[#allocation25_spill]] %s4641_s4 }
   0x4   :  { %11 = vsyncpa [#allocation7], 0 }
   0x5   :  { %13 = vsyncpa [#allocation7 + $0x1], 0 }
   0x6   :  { %14 = vsyncpa [#allocation10], 0 }
   0x7   :  { %16 = vsyncpa [#allocation10 + $0x1], 0 }
   0x8   :  { %17 = vsyncpa [#allocation13], 0 }
   0x9   :  { %18 = vsyncpa [#allocation8], 0 }
   0xa   :  { %20 = vsyncpa [#allocation8 + $0x1], 0  ;;  %s3813_s21 = smov 0   ;;  %s3815_s22 = smov 0  }
   0xb   :  { %s3817_s23 = smov 0   ;;  %s3819_s24 = smov 0  }
   0xc   :  { %s3821_s25 = smov 0   ;;  %s3823_s26 = smov 0  }
   0xd LB: > { %4653 = sst [smem:[#allocation21_spill]] %s3728_s21  ;;  %s3844_s27 = sadd.s32 4294967295, %s3748_s26   ;;  %s3748_s26 = sphi %s3823_s26, %s26_s26   ;;  %s3744_s25 = sphi %s3821_s25, %s4681_s25   ;;  %s3740_s24 = sphi %s3819_s24, %s4680_s24   ;;  %s3736_s23 = sphi %s3817_s23, %s4679_s23   ;;  %s3732_s22 = sphi %s3815_s22, %s4678_s22   ;;  %s3728_s21 = sphi %s3813_s21, %s4677_s21  }
   0xe   : > { %s3124_s28 = sadd.s32 4294967294, %s3748_s26   ;;  %p67_p0 = scmp.ne.s32.totalorder %s3732_s22, %s3728_s21 }
   0xf   : > { %p4644_p1 = scmp.eq.s32.totalorder %s3844_s27, 0  ;;  %p211_p3 = scmp.eq.s32.totalorder %s3124_s28, 1 }
  0x10   : > { %p3125_p5 = scmp.ge.s32.totalorder %s3748_s26, 1  ;;  %p218_p7 = scmp.lt.s32.totalorder %s3748_s26, 3 }
  0x11   : > { %p3853_p4 = por %p4644_p1, %p67_p0  ;;  %p3858_p6 = por %p211_p3, %p67_p0 }
  0x12   : > { %p3863_p8 = pnand %p3125_p5, %p218_p7  ;;  %s3750_s8 = smov [#allocation11]  }
  0x13   : > { %s4654_s29 = scalar_select %p3853_p4, 1, 0 }
  0x14   : > { %s4655_s30 = scalar_select %p3858_p6, 1, 0 }
  0x15   : > { %s4657_s7 = scalar_select %p3863_p8, 1, 0 }
  0x16   : > { %4656 = sst [smem:[#allocation22_spill]] %s4655_s30  ;;  %s230_s9 = sshll.u32 %s3750_s8, 4  ;;  %s3867_s9 = int_to_ptr.vmem [resolvable:$true] %s230_s9 }
  0x17   : > { %p3382_p9 = pneg %p3863_p8  ;;  %s3751_s11 = smov [#allocation12]  }
  0x18   : > { %s243_s12 = sshll.u32 %s3751_s11, 4  ;;  %s3752_s13 = smov [#allocation14]   ;;  %s3878_s12 = int_to_ptr.vmem [resolvable:$true] %s243_s12 }
  0x19   : > { %p3874_p11 = pnand %p3382_p9, %p4644_p1  ;;  %s3880_s14 = sshll.u32 %s3752_s13, 4  ;;  %s257_s14 = int_to_ptr.vmem [resolvable:$true] %s3880_s14 }
  0x1a   : > { %s4659_s2 = sld [smem:[#allocation23_spill]] }
  0x1b   : > { %p3890_p13 = pneg %p3874_p11 }
  0x20   : > { %s3510_s17 = scalar_lea.hbm %s4659_s2, 256 }
  0x21   : > { %p3511_p12 = scmp.ne.s32.totalorder %s4659_s2, %s3510_s17  ;;  %p3517_p5 = scmp.lt.u32.totalorder %s3510_s17, %s4659_s2 }
  0x23   : > { %p3513_p0 = pnand %p3890_p13, %p3511_p12 }
  0x25   : > { %p3514_p3 = pneg %p3513_p0 }
  0x27   : > { %p3519_p7 = pnand %p3517_p5, %p3514_p3 }
  0x29   : > { %3522 = shalt.err (!%p3519_p7)
}
  0x2a   : > { %s3523_s11 = scalar_lea.vmem %s3867_s9, 256  ;;  %p3531_p2 = scmp.lt.s32.totalorder %s3867_s9, %s3867_s9 }
  0x2b   : > { %p3524_p9 = scmp.ne.s32.totalorder %s3867_s9, %s3523_s11  ;;  %p3532_p6 = scmp.lt.s32.totalorder %s3523_s11, %s3523_s11 }
  0x2d   : > { %p3526_p10 = pnand %p3524_p9, %p3890_p13  ;;  %p3533_p12 = por %p3532_p6, %p3531_p2 }
  0x2f   : > { %p3527_p1 = pneg %p3526_p10 }
  0x31   : > { %p3534_p0 = pnand %p3533_p12, %p3527_p1 }
  0x33   : > { %3537 = shalt.err (!%p3534_p0)
}
  0x34   : > { %s3753_s13 = smov 64   ;;  %s3754_s15 = smov 4  }
  0x35   : > { %3385 = dma.hbm_to_vmem [thread:$0]  (!%p3874_p11), %s4659_s2, 256, %s3867_s9, [#allocation10], %s3753_s13, %s3753_s13, %s3754_s15  }
  0x36   : > { %s4661_s3 = sld [smem:[#allocation24_spill]] }
  0x3c   : > { %s3538_s28 = scalar_lea.hbm %s4661_s3, 256 }
  0x3d   : > { %p3539_p1 = scmp.ne.s32.totalorder %s4661_s3, %s3538_s28  ;;  %p3545_p10 = scmp.lt.u32.totalorder %s3538_s28, %s4661_s3 }
  0x3f   : > { %p3541_p2 = pnand %p3539_p1, %p3890_p13 }
  0x41   : > { %p3542_p6 = pneg %p3541_p2 }
  0x43   : > { %p3547_p3 = pnand %p3545_p10, %p3542_p6 }
  0x45   : > { %3550 = shalt.err (!%p3547_p3)
}
  0x46   : > { %s3551_s9 = scalar_lea.vmem %s3878_s12, 256  ;;  %p3559_p12 = scmp.lt.s32.totalorder %s3878_s12, %s3878_s12 }
  0x47   : > { %p3552_p5 = scmp.ne.s32.totalorder %s3878_s12, %s3551_s9  ;;  %p3560_p0 = scmp.lt.s32.totalorder %s3551_s9, %s3551_s9 }
  0x49   : > { %p3554_p7 = pnand %p3552_p5, %p3890_p13  ;;  %p3561_p1 = por %p3560_p0, %p3559_p12 }
  0x4b   : > { %p3555_p9 = pneg %p3554_p7 }
  0x4d   : > { %p3562_p2 = pnand %p3561_p1, %p3555_p9 }
  0x4f   : > { %3565 = shalt.err (!%p3562_p2)
}
  0x50   : > { %3388 = dma.hbm_to_vmem [thread:$0]  (!%p3874_p11), %s4661_s3, 256, %s3878_s12, [#allocation13], %s3753_s13, %s3753_s13, %s3754_s15  }
  0x51   : > { %s4662_s4 = sld [smem:[#allocation25_spill]] }
  0x57   : > { %s3566_s18 = scalar_lea.hbm %s4662_s4, 256 }
  0x58   : > { %p3567_p6 = scmp.ne.s32.totalorder %s4662_s4, %s3566_s18  ;;  %p3573_p5 = scmp.lt.u32.totalorder %s3566_s18, %s4662_s4 }
  0x5a   : > { %p3569_p10 = pnand %p3567_p6, %p3890_p13 }
  0x5c   : > { %p3570_p3 = pneg %p3569_p10 }
  0x5e   : > { %p3575_p7 = pnand %p3573_p5, %p3570_p3 }
  0x60   : > { %3578 = shalt.err (!%p3575_p7)
}
  0x61   : > { %s3579_s9 = scalar_lea.vmem %s257_s14, 256  ;;  %p3587_p1 = scmp.lt.s32.totalorder %s257_s14, %s257_s14 }
  0x62   : > { %p3580_p9 = scmp.ne.s32.totalorder %s257_s14, %s3579_s9  ;;  %p3588_p2 = scmp.lt.s32.totalorder %s3579_s9, %s3579_s9 }
  0x64   : > { %p3582_p12 = pnand %p3580_p9, %p3890_p13  ;;  %p3589_p4 = por %p3588_p2, %p3587_p1 }
  0x66   : > { %p3583_p0 = pneg %p3582_p12 }
  0x68   : > { %p3590_p8 = pnand %p3589_p4, %p3583_p0 }
  0x6a   : > { %3593 = shalt.err (!%p3590_p8)
}
  0x6b   : > { %3391 = dma.hbm_to_vmem [thread:$0]  (!%p3874_p11), %s4662_s4, 256, %s257_s14, [#allocation13], %s3753_s13, %s3753_s13, %s3754_s15  }
  0x6c   : > { %s54_s20 = sadd.s32 1, %s3736_s23  ;;  %s45_s10 = sadd.s32 1, %s3744_s25 }
  0x6d   : > { %p61_p4 = scmp.ne.s32.totalorder %s3736_s23, %s3732_s22  ;;  %p47_p8 = scmp.ge.s32.totalorder %s45_s10, 2 }
  0x6e   : > { %p62_p13 = scmp.eq.s32.totalorder %s3748_s26, 0  ;;  %p4663_p6 = scmp.eq.s32.totalorder %s3844_s27, 1 }
  0x6f   : > { %p3406_p3 = scmp.lt.s32.totalorder %s3748_s26, 2  ;;  %s4683_s10 = smov (%p47_p8, %s45_s10), 0 }
  0x70   : > { %p3969_p10 = por %p4663_p6, %p61_p4  ;;  %p63_p5 = por %p62_p13, %p61_p4 }
  0x71   : > { %s273_s16 = sand.u32 1, %s3736_s23   ;;  %s49_s17 = ssub.s32 %s3744_s25, %s4683_s10 }
  0x72   : > { %s4664_s30 = scalar_select %p3969_p10, 1, 0 }
  0x73   : > { %p52_p11 = scmp.eq.s32.totalorder %s49_s17, 0  ;;  %s3979_s14 = sshll.u32 %s273_s16, 2 }
  0x74   : > { %s3131_s13 = sshll.u32 %s3744_s25, 6  ;;  %s277_s8 = scalar_lea.vmem [#allocation6], %s3979_s14 }
  0x75   : > { %s3983_s15 = scalar_select %p52_p11, %s3736_s23, %s54_s20  }
  0x76   : > { %s3988_s28 = scalar_lea.hbm %s4637_s0, %s3131_s13  ;;  %s285_s11 = sshll.u32 %s277_s8, 4  ;;  %s3991_s11 = int_to_ptr.vmem [resolvable:$true] %s285_s11 }
  0x77   : > { %p3995_p7 = pnand %p3406_p3, %p63_p5  ;;  %s4002_s20 = scalar_lea.hbm %s4638_s1, %s3131_s13 }
  0x78   : > { %s292_s17 = sand.u32 1, %s3748_s26   ;;  %s274_s18 = scalar_lea.sflag [#allocation7], %s273_s16 }
  0x79   : > { %s3594_s19 = scalar_lea.hbm %s3988_s28, 64  ;;  %p3596_p12 = pneg %p3995_p7 }
  0x7a   : > { %p3595_p9 = scmp.ne.s32.totalorder %s3988_s28, %s3594_s19  ;;  %s3599_s3 = scalar_lea.hbm %s4637_s0, 128 }
  0x7b   : > { %p3600_p2 = scmp.lt.u32.totalorder %s3988_s28, %s4637_s0  ;;  %p3601_p4 = scmp.lt.u32.totalorder %s3599_s3, %s3594_s19 }
  0x7c   : > { %p3597_p0 = pnand %p3596_p12, %p3595_p9  ;;  %p3603_p13 = scmp.lt.u32.totalorder %s3594_s19, %s3988_s28 }
  0x7d   : > { %p3602_p8 = por %p3601_p4, %p3600_p2 }
  0x7e   : > { %p3598_p1 = pneg %p3597_p0 }
  0x7f   : > { %p3604_p6 = por %p3603_p13, %p3602_p8 }
  0x81   : > { %p3605_p3 = pnand %p3604_p6, %p3598_p1 }
  0x83   : > { %3608 = shalt.err (!%p3605_p3)
}
  0x84   : > { %s3609_s16 = scalar_lea.vmem %s3991_s11, 64  ;;  %s3755_s2 = smov [#allocation6]  }
  0x85   : > { %p3610_p5 = scmp.ne.s32.totalorder %s3991_s11, %s3609_s16  ;;  %s3614_s13 = sshll.u32 %s3755_s2, 4  ;;  %s3615_s13 = int_to_ptr.vmem [resolvable:$false] %s3614_s13 }
  0x86   : > { %s3616_s4 = scalar_lea.vmem %s3615_s13, 128  ;;  %p3617_p0 = scmp.lt.s32.totalorder %s3991_s11, %s3615_s13 }
  0x87   : > { %p3612_p11 = pnand %p3610_p5, %p3596_p12  ;;  %p3618_p2 = scmp.lt.s32.totalorder %s3616_s4, %s3609_s16 }
  0x89   : > { %p3613_p9 = pneg %p3612_p11  ;;  %p3619_p4 = por %p3618_p2, %p3617_p0 }
  0x8b   : > { %p3620_p8 = pnand %p3619_p4, %p3613_p9 }
  0x8d   : > { %3623 = shalt.err (!%p3620_p8)
}
  0x8e   : > { %3395 = dma.hbm_to_vmem [thread:$0]  (!%p3995_p7), %s3988_s28, 64, %s3991_s11, %s274_s18  }
  0x8f   : > { %s296_s3 = scalar_lea.vmem [#allocation9], %s3979_s14  ;;  %s293_s19 = scalar_lea.sflag [#allocation10], %s292_s17 }
  0x90   : > { %s304_s21 = sshll.u32 %s296_s3, 4  ;;  %s3624_s8 = scalar_lea.hbm %s4002_s20, 64  ;;  %s305_s21 = int_to_ptr.vmem [resolvable:$true] %s304_s21 }
  0x91   : > { %p3625_p1 = scmp.ne.s32.totalorder %s4002_s20, %s3624_s8  ;;  %s3629_s2 = scalar_lea.hbm %s4638_s1, 128 }
  0x92   : > { %p3630_p3 = scmp.lt.u32.totalorder %s4002_s20, %s4638_s1  ;;  %p3631_p5 = scmp.lt.u32.totalorder %s3629_s2, %s3624_s8 }
  0x93   : > { %p3627_p13 = pnand %p3625_p1, %p3596_p12  ;;  %p3633_p9 = scmp.lt.u32.totalorder %s3624_s8, %s4002_s20 }
  0x94   : > { %p3632_p11 = por %p3631_p5, %p3630_p3 }
  0x95   : > { %p3628_p6 = pneg %p3627_p13 }
  0x96   : > { %p3634_p0 = por %p3633_p9, %p3632_p11 }
  0x98   : > { %p3635_p2 = pnand %p3634_p0, %p3628_p6 }
  0x9a   : > { %3638 = shalt.err (!%p3635_p2)
}
  0x9b   : > { %s3639_s14 = scalar_lea.vmem %s305_s21, 64  ;;  %s3756_s28 = smov [#allocation9]  }
  0x9c   : > { %p3640_p4 = scmp.ne.s32.totalorder %s305_s21, %s3639_s14  ;;  %s3644_s11 = sshll.u32 %s3756_s28, 4  ;;  %s3645_s11 = int_to_ptr.vmem [resolvable:$false] %s3644_s11 }
  0x9d   : > { %s3646_s17 = scalar_lea.vmem %s3645_s11, 128  ;;  %p3647_p13 = scmp.lt.s32.totalorder %s305_s21, %s3645_s11 }
  0x9e   : > { %p3642_p8 = pnand %p3640_p4, %p3596_p12  ;;  %p3648_p10 = scmp.lt.s32.totalorder %s3646_s17, %s3639_s14 }
  0xa0   : > { %p3643_p1 = pneg %p3642_p8  ;;  %p3649_p3 = por %p3648_p10, %p3647_p13 }
  0xa2   : > { %p3650_p5 = pnand %p3649_p3, %p3643_p1 }
  0xa4   : > { %3653 = shalt.err (!%p3650_p5)
}
  0xa5   : > { %3398 = dma.hbm_to_vmem [thread:$0]  (!%p3995_p7), %s4002_s20, 64, %s305_s21, %s293_s19  }
  0xa6   : > { %p4666_p6 = scmp.ne.s32.totalorder %s4657_s7, 0 }
  0xa7   : > { %s4055_s18 = sand.u32 (!%p4666_p6), 1, %s3732_s22   ;;  %p4667_p12 = scmp.ne.s32.totalorder (!%p4666_p6), %s4654_s29, 0 }
  0xa8   : > { %313 = sbr.rel (%p4666_p6) target bundleno = 1784 (0x6f8), region = 44  ;;  %s3135_s3 = sshll.u32 (!%p4666_p6), %s4055_s18, 2 }
  0xa9   : > { %s316_s8 = scalar_lea.sflag (!%p4666_p6), [#allocation7], %s4055_s18  ;;  %s319_s12 = scalar_lea.vmem (!%p4666_p6), [#allocation6], %s3135_s3 }
  0xaf   : > { %3707 = dma.done.wait (%p4667_p12), %s316_s8, 64  }
  0xb0   : > { %3709 = vsyncadd (%p4667_p12), %s316_s8, 4294967232  ;;  %s324_s9 = sand.u32 1, %s3844_s27   ;;  %s328_s7 = scalar_lea.vmem [#allocation9], %s3135_s3 }
  0xb1   : > { %s325_s20 = scalar_lea.sflag [#allocation10], %s324_s9 }
  0xb2   : > { %3711 = dma.done.wait (%p4667_p12), %s325_s20, 64  }
  0xb3   : > { %3713 = vsyncadd (%p4667_p12), %s325_s20, 4294967232  ;;  %p4668_p10 = scmp.eq.s32.totalorder %s3844_s27, 0 }
  0xb5   : > { %3715 = dma.done.wait (%p4668_p10), [#allocation10], 256   ;;  %p4669_p7 = pmov %p4668_p10 }
  0xb7   : > { %3717 = vsyncadd (%p4669_p7), [#allocation10], 4294967040  ;;  %p4670_p11 = pmov %p4669_p7 }
  0xb8   : > { %p4671_p9 = pmov %p4669_p7 }
  0xb9   : > { %3719 = dma.done.wait (%p4670_p11), [#allocation13], 512  }
  0xba   : > { %3721 = vsyncadd (%p4671_p9), [#allocation13], 4294966784  ;;  %v3757_v0 = vmov 0.0   ;;  %vm3758_vm0 = vmmov 0   ;;  %v3484_v1 = vld [vmem:[#allocation11] sm:$0xff]   ;;  %v3485_v2 = vld [vmem:[#allocation12] sm:$0xff]   ;;  %v467_v17 = vlaneseq }
  0xbb   : > { %3244 = vmatprep.subr.bf16.mxu0 %v3757_v0  ;;  %3252 = vmatprep.subr.bf16.mxu1 %v3757_v0  ;;  %v3486_v3 = vld [vmem:[#allocation11 + $0x8] sm:$0xff]   ;;  %v3487_v4 = vld [vmem:[#allocation12 + $0x8] sm:$0xff]   ;;  %v379_v5 = vld [vmem:[%s319_s12] sm:$0xf]  ;;  %vm396_vm1 = vcmask 261120   ;;  %s3759_s27 = smov 116  }
  0xbc   : > { %3248 = vmatprep.mubr.msk.bf16.mxu0 %vm3758_vm0, %v3757_v0  ;;  %3256 = vmatprep.mubr.msk.bf16.mxu1 %vm3758_vm0, %v3757_v0  ;;  %v763_v6 = vld [vmem:[%s328_s7] sm:$0xf]  ;;  %s3760_s29 = smov 124   ;;  %s3761_s21 = smov 120   ;;  %vm754_vm2 = vcmask 31744   ;;  %v4118_v21 = vshrl.u32 %v467_v17, 7 }
  0xbd   : > { %3245 = vmatpush3.bf16.msra.mxu0 %v3484_v1  ;;  %3253 = vmatpush3.bf16.msra.mxu1 %v3485_v2  ;;  %s3762_s19 = smov 108   ;;  %s3763_s16 = smov 112   ;;  %755 = vst.msk [vmem:[#allocation5] sm:$0xff] %vm754_vm2, %v3757_v0  ;;  %756 = vst.msk [vmem:[#allocation5 + $0x8] sm:$0xff] %vm754_vm2, %v3757_v0  ;;  %v3766_v15 = vmov 1983009808  }
  0xbe   : > { %3246 = vmatprep.subr.bf16.mxu0 %v3757_v0  ;;  %3254 = vmatprep.subr.bf16.mxu1 %v3757_v0  ;;  %s3764_s2 = smov 100   ;;  %s3765_s13 = smov 104   ;;  %757 = vst.msk [vmem:[#allocation5 + $0x10] sm:$0xff] %vm754_vm2, %v3757_v0  ;;  %758 = vst.msk [vmem:[#allocation5 + $0x18] sm:$0xff] %vm754_vm2, %v3757_v0  ;;  %v465_v16 = vunpack.c.l.s4 %v3766_v15  ;;  %v3767_v18 = vmov 1934713408  }
  0xbf   : > { %759 = vst.msk [vmem:[#allocation5 + $0x20] sm:$0xff] %vm754_vm2, %v3757_v0  ;;  %760 = vst.msk [vmem:[#allocation5 + $0x28] sm:$0xff] %vm754_vm2, %v3757_v0  ;;  %v529_v19 = vunpack.c.l.s4 %v3767_v18  ;;  %vm742_vm3 = vcmask 27648   ;;  %vm751_vm4 = vcmask 64512   ;;  %s3769_s4 = smov 96   ;;  %vm1875_vm5 = vcmask 1041409  }
  0xc0   : > { %761 = vst.msk [vmem:[#allocation5 + $0x30] sm:$0xff] %vm754_vm2, %v3757_v0  ;;  %762 = vst.msk [vmem:[#allocation5 + $0x38] sm:$0xff] %vm754_vm2, %v3757_v0  ;;  %v466_v20 = vunpack.c.0.s8 %v465_v16  ;;  %vm1877_vm6 = vcmask 1042434   ;;  %vm1879_vm7 = vcmask 1043459   ;;  %vm1881_vm8 = vcmask 1044484   ;;  %s3770_s14 = smov 8  }
  0xc1   : > { %3247 = vmatpush3.bf16.msra.mxu0 %v3486_v3  ;;  %3255 = vmatpush3.bf16.msra.mxu1 %v3487_v4  ;;  %v530_v24 = vunpack.c.0.s8 %v529_v19  ;;  %753 = vst.msk [vmem:[#allocation4] sm:$0xff] %vm751_vm4, %v3757_v0  ;;  %vm1883_vm9 = vcmask 1045509   ;;  %vm1885_vm10 = vcmask 1046534   ;;  %vm1887_vm11 = vcmask 1047559   ;;  %s3771_s28 = smov 4   ;;  %s3772_s11 = smov 12  }
  0xc2   : > { %3260 = vmatprep.subr.bf16.mxu0 %v3757_v0  ;;  %3266 = vmatprep.subr.bf16.mxu1 %v3757_v0  ;;  %v4121_v25 = vsub.s32 %v466_v20, %v4118_v21  ;;  %vm2061_vm12 = vcmask 1043456   ;;  %s3773_s17 = smov 20   ;;  %s3774_s3 = smov 16   ;;  %vm2895_vm13 = vcmask 97280   ;;  %vm2897_vm14 = vcmask 130048  }
  0xc3   : > { %v4126_v32 = vsub.s32 %v530_v24, %v4118_v21  ;;  %s3775_s8 = smov 28   ;;  %s3776_s12 = smov 24   ;;  %vm2899_vm15 = vcmask 162816  }
  0xc4   : > { %3249 = vmatmul.mubr.msk.bf16.vlgmr.msra.gmra.mrb[0].mxu0 %vm396_vm1, %v379_v5  ;;  %3257 = vmatmul.mubr.msk.bf16.vlgmr.msra.gmra.mrb[0].mxu1 %vm396_vm1, %v763_v6  ;;  %s3140_s9 = sshll.u32 %s4055_s18, 3  ;;  %p4672_p2 = scmp.ne.s32.totalorder %s4664_s30, 0 }
  0xc5   : > { %3262 = vmatprep.mubr.msk.bf16.mxu0 %vm3758_vm0, %v3757_v0  ;;  %3268 = vmatprep.mubr.msk.bf16.mxu1 %vm3758_vm0, %v3757_v0 }
 0x197   : > { %v434_v7 = vpop.f32.mrb[0].mxu0  ;;  %v4092_v8 = vpop.f32.mrb[0].mxu1 }
 0x198   : > { %447 = vrot.lane.b32.xlu1 %v434_v7, %s3759_s27  ;;  %441 = vrot.lane.b32.xlu0 %v434_v7, %s3760_s29  ;;  %v3250_v9 = vpop.f32.mrb[1].mxu0  ;;  %v3258_v11 = vpop.f32.mrb[1].mxu1 }
 0x199   : > { %v437_v10 = vpop.f32.mrb[2].mxu0  ;;  %v821_v13 = vpop.f32.mrb[2].mxu1 }
 0x19a   : > { %v3251_v12 = vpop.f32.mrb[3].mxu0  ;;  %v3259_v14 = vpop.f32.mrb[3].mxu1 }
 0x19c   : > { %825 = vrot.lane.b32.xlu1 %v4092_v8, %s3760_s29  ;;  %444 = vrot.lane.b32.xlu0 %v434_v7, %s3761_s21  ;;  %s373_s29 = scalar_lea.vmem [#allocation15], %s3140_s9 }
 0x1a0   : > { %831 = vrot.lane.b32.xlu1 %v4092_v8, %s3759_s27  ;;  %828 = vrot.lane.b32.xlu0 %v4092_v8, %s3761_s21  ;;  %s3200_s27 = sshll.u32 %s3740_s24, 7  ;;  %s2988_s21 = sshll.u32 %s373_s29, 4  ;;  %s4589_s21 = int_to_ptr.vmem [resolvable:$true] %s2988_s21 }
 0x1a1   : > { %s2974_s24 = scalar_lea.sflag [#allocation8], %s4055_s18 }
 0x1a4   : > { %453 = vrot.lane.b32.xlu1 %v434_v7, %s3762_s19  ;;  %450 = vrot.lane.b32.xlu0 %v434_v7, %s3763_s16 }
 0x1a8   : > { %459 = vrot.lane.b32.xlu1 %v434_v7, %s3764_s2  ;;  %456 = vrot.lane.b32.xlu0 %v434_v7, %s3765_s13 }
 0x1ac   : > { %837 = vrot.lane.b32.xlu1 %v4092_v8, %s3762_s19  ;;  %834 = vrot.lane.b32.xlu0 %v4092_v8, %s3763_s16 }
 0x1b0   : > { %843 = vrot.lane.b32.xlu1 %v4092_v8, %s3764_s2  ;;  %840 = vrot.lane.b32.xlu0 %v4092_v8, %s3765_s13  ;;  %s4587_s2 = scalar_lea.hbm %s4643_s6, %s3200_s27  ;;  %s3654_s13 = scalar_lea.vmem %s4589_s21, 128 }
 0x1b1   : > { %p3655_p0 = scmp.ne.s32.totalorder %s4589_s21, %s3654_s13 }
 0x1b3   : > { %p3656_p4 = pnand %p3655_p0, %p4672_p2 }
 0x1b5   : > { %p3657_p8 = pneg %p3656_p4 }
 0x20a   : > { %v448_v22 = vpop.permute.xlu1 %447  ;;  %v442_v23 = vpop.permute.xlu0 %441 }
 0x20b   : > { %v478_v26 = vcombine.low %v442_v23, %v448_v22  ;;  %v479_v27 = vcombine.high %v442_v23, %v448_v22 }
 0x20d   : > { %v486_v33 = vrot.slane %v478_v26, %v4121_v25  ;;  %v493_v34 = vrot.slane %v479_v27, %v4121_v25 }
 0x20e   : > { %v4123_v28 = vpop.permute.xlu1 %825  ;;  %v445_v29 = vpop.permute.xlu0 %444 }
 0x20f   : > { %v462_v30 = vcombine.low %v434_v7, %v445_v29  ;;  %v463_v31 = vcombine.high %v434_v7, %v445_v29 }
 0x211   : > { %v470_v35 = vrot.slane %v462_v30, %v4121_v25  ;;  %v477_v36 = vrot.slane %v463_v31, %v4121_v25 }
 0x212   : > { %v4132_v37 = vpop.permute.xlu1 %831  ;;  %v4134_v38 = vpop.permute.xlu0 %828 }
 0x213   : > { %v526_v39 = vcombine.low %v470_v35, %v486_v33  ;;  %v527_v40 = vcombine.high %v470_v35, %v486_v33  ;;  %v542_v41 = vcombine.low %v477_v36, %v493_v34  ;;  %v543_v42 = vcombine.high %v477_v36, %v493_v34 }
 0x214   : > { %v862_v43 = vcombine.low %v4123_v28, %v4132_v37  ;;  %v863_v44 = vcombine.high %v4123_v28, %v4132_v37  ;;  %v846_v45 = vcombine.low %v4092_v8, %v4134_v38  ;;  %v847_v46 = vcombine.high %v4092_v8, %v4134_v38 }
 0x215   : > { %v534_v47 = vrot.slane %v526_v39, %v4126_v32  ;;  %v541_v48 = vrot.slane %v527_v40, %v4126_v32  ;;  %v550_v49 = vrot.slane %v542_v41, %v4126_v32  ;;  %v557_v50 = vrot.slane %v543_v42, %v4126_v32 }
 0x216   : > { %v870_v51 = vrot.slane %v862_v43, %v4121_v25  ;;  %v877_v52 = vrot.slane %v863_v44, %v4121_v25  ;;  %v854_v53 = vrot.slane %v846_v45, %v4121_v25  ;;  %v861_v54 = vrot.slane %v847_v46, %v4121_v25  ;;  %v454_v55 = vpop.permute.xlu1 %453  ;;  %v451_v56 = vpop.permute.xlu0 %450 }
 0x217   : > { %v3144_v57 = vcombine.low %v534_v47, %v541_v48  ;;  %v3146_v58 = vcombine.high %v534_v47, %v541_v48  ;;  %v3148_v59 = vcombine.low %v550_v49, %v557_v50  ;;  %v3150_v60 = vcombine.high %v550_v49, %v557_v50 }
 0x218   : > { %v910_v61 = vcombine.low %v854_v53, %v870_v51  ;;  %v911_v62 = vcombine.high %v854_v53, %v870_v51  ;;  %v926_v63 = vcombine.low %v861_v54, %v877_v52  ;;  %v927_v1 = vcombine.high %v861_v54, %v877_v52 }
 0x219   : > { %v606_v2 = vrot.slane %v3144_v57, %v4121_v25  ;;  %v622_v3 = vrot.slane %v3146_v58, %v4121_v25  ;;  %v638_v4 = vrot.slane %v3148_v59, %v4121_v25  ;;  %v654_v5 = vrot.slane %v3150_v60, %v4121_v25 }
 0x21a   : > { %v4157_v6 = vrot.slane %v910_v61, %v4126_v32  ;;  %v4160_v7 = vrot.slane %v911_v62, %v4126_v32  ;;  %v4163_v9 = vrot.slane %v926_v63, %v4126_v32  ;;  %v4166_v10 = vrot.slane %v927_v1, %v4126_v32  ;;  %v460_v11 = vpop.permute.xlu1 %459  ;;  %v457_v12 = vpop.permute.xlu0 %456 }
 0x21b   : > { %v662_v13 = vcombine.low %v606_v2, %v622_v3  ;;  %v663_v14 = vcombine.high %v606_v2, %v622_v3  ;;  %v694_v15 = vcombine.low %v638_v4, %v654_v5  ;;  %v695_v16 = vcombine.high %v638_v4, %v654_v5 }
 0x21c   : > { %v3155_v18 = vcombine.low %v4157_v6, %v4160_v7  ;;  %v3157_v19 = vcombine.high %v4157_v6, %v4160_v7  ;;  %v3159_v20 = vcombine.low %v4163_v9, %v4166_v10  ;;  %v3161_v22 = vcombine.high %v4163_v9, %v4166_v10 }
 0x21d   : > { %v670_v23 = vrot.slane %v662_v13, %v4126_v32  ;;  %v677_v24 = vrot.slane %v663_v14, %v4126_v32  ;;  %v702_v26 = vrot.slane %v694_v15, %v4126_v32  ;;  %v709_v27 = vrot.slane %v695_v16, %v4126_v32 }
 0x21e   : > { %v510_v29 = vcombine.low %v454_v55, %v460_v11  ;;  %v511_v30 = vcombine.high %v454_v55, %v460_v11  ;;  %v494_v31 = vcombine.low %v451_v56, %v457_v12  ;;  %v495_v33 = vcombine.high %v451_v56, %v457_v12  ;;  %v4180_v34 = vpop.permute.xlu1 %837  ;;  %v4182_v35 = vpop.permute.xlu0 %834 }
 0x21f   : > { %v726_v36 = vcombine.low %v670_v23, %v702_v26  ;;  %v727_v39 = vcombine.high %v670_v23, %v702_v26  ;;  %v728_v40 = vcombine.low %v677_v24, %v709_v27  ;;  %v729_v41 = vcombine.high %v677_v24, %v709_v27 }
 0x220   : > { %v518_v42 = vrot.slane %v510_v29, %v4121_v25  ;;  %v525_v43 = vrot.slane %v511_v30, %v4121_v25  ;;  %v502_v44 = vrot.slane %v494_v31, %v4121_v25  ;;  %v509_v45 = vrot.slane %v495_v33, %v4121_v25 }
 0x221   : > { %v734_v46 = vpack.c.bf16 %v726_v36, %v726_v36  ;;  %v735_v47 = vpack.c.bf16 %v727_v39, %v727_v39  ;;  %v736_v48 = vpack.c.bf16 %v728_v40, %v728_v40  ;;  %v737_v49 = vpack.c.bf16 %v729_v41, %v729_v41 }
 0x222   : > { %v558_v50 = vcombine.low %v502_v44, %v518_v42  ;;  %v559_v51 = vcombine.high %v502_v44, %v518_v42  ;;  %v574_v52 = vcombine.low %v509_v45, %v525_v43  ;;  %v575_v53 = vcombine.high %v509_v45, %v525_v43  ;;  %v4188_v54 = vpop.permute.xlu1 %843  ;;  %v4190_v55 = vpop.permute.xlu0 %840 }
 0x223   : > { %743 = vst.msk [vmem:[#allocation2] sm:$0xf] %vm742_vm3, %v734_v46  ;;  %744 = vst.msk [vmem:[#allocation2 + $0x4] sm:$0xf] %vm742_vm3, %v735_v47  ;;  %v894_v56 = vcombine.low %v4180_v34, %v4188_v54  ;;  %v895_v57 = vcombine.high %v4180_v34, %v4188_v54  ;;  %v878_v58 = vcombine.low %v4182_v35, %v4190_v55 }
 0x224   : > { %745 = vst.msk [vmem:[#allocation2 + $0x8] sm:$0xf] %vm742_vm3, %v736_v48  ;;  %746 = vst.msk [vmem:[#allocation2 + $0xc] sm:$0xf] %vm742_vm3, %v737_v49  ;;  %v879_v59 = vcombine.high %v4182_v35, %v4190_v55  ;;  %v566_v60 = vrot.slane %v558_v50, %v4126_v32  ;;  %v573_v61 = vrot.slane %v559_v51, %v4126_v32 }
 0x225   : > { %v582_v62 = vrot.slane %v574_v52, %v4126_v32  ;;  %v589_v63 = vrot.slane %v575_v53, %v4126_v32  ;;  %v902_v1 = vrot.slane %v894_v56, %v4121_v25  ;;  %v909_v2 = vrot.slane %v895_v57, %v4121_v25 }
 0x226   : > { %v886_v3 = vrot.slane %v878_v58, %v4121_v25  ;;  %v893_v4 = vrot.slane %v879_v59, %v4121_v25  ;;  %v3145_v5 = vcombine.low %v566_v60, %v573_v61  ;;  %v3147_v11 = vcombine.high %v566_v60, %v573_v61 }
 0x227   : > { %v3149_v12 = vcombine.low %v582_v62, %v589_v63  ;;  %v3151_v13 = vcombine.high %v582_v62, %v589_v63  ;;  %v990_v51 = vrot.slane %v3155_v18, %v4121_v25  ;;  %v1006_v52 = vrot.slane %v3157_v19, %v4121_v25 }
 0x228   : > { %v942_v14 = vcombine.low %v886_v3, %v902_v1  ;;  %v943_v15 = vcombine.high %v886_v3, %v902_v1  ;;  %v958_v16 = vcombine.low %v893_v4, %v909_v2  ;;  %v959_v23 = vcombine.high %v893_v4, %v909_v2 }
 0x229   : > { %v613_v24 = vrot.slane %v3145_v5, %v4121_v25  ;;  %v629_v26 = vrot.slane %v3147_v11, %v4121_v25  ;;  %v645_v27 = vrot.slane %v3149_v12, %v4121_v25  ;;  %v661_v29 = vrot.slane %v3151_v13, %v4121_v25 }
 0x22a   : > { %v950_v30 = vrot.slane %v942_v14, %v4126_v32  ;;  %v957_v31 = vrot.slane %v943_v15, %v4126_v32  ;;  %v966_v33 = vrot.slane %v958_v16, %v4126_v32  ;;  %v973_v36 = vrot.slane %v959_v23, %v4126_v32 }
 0x22b   : > { %v678_v39 = vcombine.low %v613_v24, %v629_v26  ;;  %v679_v40 = vcombine.high %v613_v24, %v629_v26  ;;  %v710_v41 = vcombine.low %v645_v27, %v661_v29  ;;  %v711_v42 = vcombine.high %v645_v27, %v661_v29 }
 0x22c   : > { %v3156_v43 = vcombine.low %v950_v30, %v957_v31  ;;  %v3158_v44 = vcombine.high %v950_v30, %v957_v31  ;;  %v3160_v45 = vcombine.low %v966_v33, %v973_v36  ;;  %v3162_v46 = vcombine.high %v966_v33, %v973_v36 }
 0x22d   : > { %v686_v47 = vrot.slane %v678_v39, %v4126_v32  ;;  %v693_v48 = vrot.slane %v679_v40, %v4126_v32  ;;  %v718_v49 = vrot.slane %v710_v41, %v4126_v32  ;;  %v725_v50 = vrot.slane %v711_v42, %v4126_v32  ;;  %v1430_v40 = vld [vmem:[#allocation2] sm:$0xf]  ;;  %v1431_v41 = vld [vmem:[#allocation2 + $0x4] sm:$0xf] }
 0x22e   : > { %v1022_v53 = vrot.slane %v3159_v20, %v4121_v25  ;;  %v1038_v56 = vrot.slane %v3161_v22, %v4121_v25  ;;  %v1046_v18 = vcombine.low %v990_v51, %v1006_v52  ;;  %v1047_v62 = vcombine.high %v990_v51, %v1006_v52  ;;  %v1432_v52 = vld [vmem:[#allocation2 + $0x8] sm:$0xf] }
 0x22f   : > { %v730_v57 = vcombine.low %v686_v47, %v718_v49  ;;  %v731_v58 = vcombine.high %v686_v47, %v718_v49  ;;  %v732_v59 = vcombine.low %v693_v48, %v725_v50  ;;  %v733_v60 = vcombine.high %v693_v48, %v725_v50 }
 0x230   : > { %v1078_v61 = vcombine.low %v1022_v53, %v1038_v56  ;;  %v1079_v63 = vcombine.high %v1022_v53, %v1038_v56  ;;  %v1054_v2 = vrot.slane %v1046_v18, %v4126_v32  ;;  %v997_v9 = vrot.slane %v3156_v43, %v4121_v25  ;;  %v1433_v53 = vld [vmem:[#allocation2 + $0xc] sm:$0xf] }
 0x231   : > { %v738_v6 = vpack.c.bf16 %v730_v57, %v730_v57  ;;  %v739_v7 = vpack.c.bf16 %v731_v58, %v731_v58  ;;  %v740_v19 = vpack.c.bf16 %v732_v59, %v732_v59  ;;  %v741_v1 = vpack.c.bf16 %v733_v60, %v733_v60 }
 0x232   : > { %v1086_v20 = vrot.slane %v1078_v61, %v4126_v32  ;;  %v1013_v10 = vrot.slane %v3158_v44, %v4121_v25  ;;  %v1029_v22 = vrot.slane %v3160_v45, %v4121_v25  ;;  %v1045_v3 = vrot.slane %v3162_v46, %v4121_v25 }
 0x233   : > { %747 = vst.msk [vmem:[#allocation2 + $0x10] sm:$0xf] %vm742_vm3, %v738_v6  ;;  %748 = vst.msk [vmem:[#allocation2 + $0x14] sm:$0xf] %vm742_vm3, %v739_v7  ;;  %v1061_v11 = vrot.slane %v1047_v62, %v4126_v32  ;;  %v1093_v12 = vrot.slane %v1079_v63, %v4126_v32 }
 0x234   : > { %749 = vst.msk [vmem:[#allocation2 + $0x18] sm:$0xf] %vm742_vm3, %v740_v19  ;;  %750 = vst.msk [vmem:[#allocation2 + $0x1c] sm:$0xf] %vm742_vm3, %v741_v1  ;;  %v1110_v4 = vcombine.low %v1054_v2, %v1086_v20  ;;  %v1111_v5 = vcombine.high %v1054_v2, %v1086_v20  ;;  %v1062_v15 = vcombine.low %v997_v9, %v1013_v10  ;;  %vm2903_vm3 = vcmask 228352  }
 0x235   : > { %v1094_v16 = vcombine.low %v1029_v22, %v1045_v3  ;;  %v1112_v26 = vcombine.low %v1061_v11, %v1093_v12  ;;  %v1113_v27 = vcombine.high %v1061_v11, %v1093_v12  ;;  %v1063_v44 = vcombine.high %v997_v9, %v1013_v10 }
 0x236   : > { %v1118_v13 = vpack.c.bf16 %v1110_v4, %v1110_v4  ;;  %v1119_v14 = vpack.c.bf16 %v1111_v5, %v1111_v5  ;;  %v1070_v29 = vrot.slane %v1062_v15, %v4126_v32  ;;  %v1095_v45 = vcombine.high %v1029_v22, %v1045_v3 }
 0x237   : > { %v1102_v30 = vrot.slane %v1094_v16, %v4126_v32  ;;  %v1120_v31 = vpack.c.bf16 %v1112_v26, %v1112_v26  ;;  %v1121_v33 = vpack.c.bf16 %v1113_v27, %v1113_v27  ;;  %v1077_v48 = vrot.slane %v1063_v44, %v4126_v32 }
 0x238   : > { %v1443_v23 = vsel %vm754_vm2, %v1118_v13, 0  ;;  %v1489_v24 = vsel %vm754_vm2, %v1119_v14, 0  ;;  %v1109_v49 = vrot.slane %v1095_v45, %v4126_v32 }
 0x239   : > { %3261 = vmatpush3.bf16.xpose.msra.mxu0 %v1443_v23  ;;  %3267 = vmatpush3.bf16.xpose.msra.mxu1 %v1489_v24  ;;  %v1114_v36 = vcombine.low %v1070_v29, %v1102_v30  ;;  %v1115_v39 = vcombine.high %v1070_v29, %v1102_v30  ;;  %v1535_v42 = vsel %vm754_vm2, %v1120_v31, 0  ;;  %v1581_v43 = vsel %vm754_vm2, %v1121_v33, 0 }
 0x23a   : > { %3272 = vmatprep.subr.bf16.mxu0 %v3757_v0  ;;  %3278 = vmatprep.subr.bf16.mxu1 %v3757_v0  ;;  %v1116_v56 = vcombine.low %v1077_v48, %v1109_v49  ;;  %v1117_v57 = vcombine.high %v1077_v48, %v1109_v49  ;;  %v1434_v60 = vld [vmem:[#allocation2 + $0x10] sm:$0xf]  ;;  %v1435_v18 = vld [vmem:[#allocation2 + $0x14] sm:$0xf] }
 0x23b   : > { %v1122_v46 = vpack.c.bf16 %v1114_v36, %v1114_v36  ;;  %v1123_v47 = vpack.c.bf16 %v1115_v39, %v1115_v39  ;;  %v1436_v63 = vld [vmem:[#allocation2 + $0x18] sm:$0xf]  ;;  %v1437_v6 = vld [vmem:[#allocation2 + $0x1c] sm:$0xf] }
 0x23c   : > { %v1124_v58 = vpack.c.bf16 %v1116_v56, %v1116_v56  ;;  %v1125_v59 = vpack.c.bf16 %v1117_v57, %v1117_v57  ;;  %v1842_v57 = vand.u32 127, %v467_v17 }
 0x23d   : > { %v1627_v50 = vsel %vm754_vm2, %v1122_v46, 0  ;;  %v1673_v51 = vsel %vm754_vm2, %v1123_v47, 0 }
 0x23e   : > { %v1719_v61 = vsel %vm754_vm2, %v1124_v58, 0  ;;  %v1765_v62 = vsel %vm754_vm2, %v1125_v59, 0  ;;  %v4341_v59 = vsub.s32 %v1842_v57, %v4118_v21 }
 0x240   : > { %3263 = vmatmul.mubr.msk.bf16.vlgmr.msra.gmra.mrb[4].mxu0 %vm754_vm2, %v1430_v40  ;;  %3269 = vmatmul.mubr.msk.bf16.vlgmr.msra.gmra.mrb[4].mxu1 %vm754_vm2, %v1431_v41 }
 0x241   : > { %3273 = vmatpush3.bf16.xpose.msra.mxu0 %v1535_v42  ;;  %3279 = vmatpush3.bf16.xpose.msra.mxu1 %v1581_v43 }
 0x242   : > { %3274 = vmatprep.mubr.msk.bf16.mxu0 %vm3758_vm0, %v3757_v0  ;;  %3280 = vmatprep.mubr.msk.bf16.mxu1 %vm3758_vm0, %v3757_v0 }
 0x243   : > { %3284 = vmatprep.subr.bf16.mxu0 %v3757_v0  ;;  %3290 = vmatprep.subr.bf16.mxu1 %v3757_v0 }
 0x248   : > { %3275 = vmatmul.mubr.msk.bf16.vlgmr.msra.gmra.mrb[8].mxu0 %vm754_vm2, %v1432_v52  ;;  %3281 = vmatmul.mubr.msk.bf16.vlgmr.msra.gmra.mrb[8].mxu1 %vm754_vm2, %v1433_v53  ;;  %v3768_v53 = vmov -inf  }
 0x249   : > { %3285 = vmatpush3.bf16.xpose.msra.mxu0 %v1627_v50  ;;  %3291 = vmatpush3.bf16.xpose.msra.mxu1 %v1673_v51  ;;  %752 = vst.msk [vmem:[#allocation3] sm:$0xff] %vm751_vm4, %v3768_v53 }
 0x24a   : > { %3286 = vmatprep.mubr.msk.bf16.mxu0 %vm3758_vm0, %v3757_v0  ;;  %3292 = vmatprep.mubr.msk.bf16.mxu1 %vm3758_vm0, %v3757_v0 }
 0x24b   : > { %3296 = vmatprep.subr.bf16.mxu0 %v3757_v0  ;;  %3302 = vmatprep.subr.bf16.mxu1 %v3757_v0 }
 0x250   : > { %3287 = vmatmul.mubr.msk.bf16.vlgmr.msra.gmra.mrb[12].mxu0 %vm754_vm2, %v1434_v60  ;;  %3293 = vmatmul.mubr.msk.bf16.vlgmr.msra.gmra.mrb[12].mxu1 %vm754_vm2, %v1435_v18 }
 0x251   : > { %3297 = vmatpush3.bf16.xpose.msra.mxu0 %v1719_v61  ;;  %3303 = vmatpush3.bf16.xpose.msra.mxu1 %v1765_v62 }
 0x252   : > { %3298 = vmatprep.mubr.msk.bf16.mxu0 %vm3758_vm0, %v3757_v0  ;;  %3304 = vmatprep.mubr.msk.bf16.mxu1 %vm3758_vm0, %v3757_v0 }
 0x253   : > { %3308 = vmatprep.subr.bf16.mxu0 %v3757_v0  ;;  %3314 = vmatprep.subr.bf16.mxu1 %v3757_v0 }
 0x258   : > { %3299 = vmatmul.mubr.msk.bf16.vlgmr.msra.gmra.mrb[16].mxu0 %vm754_vm2, %v1436_v63  ;;  %3305 = vmatmul.mubr.msk.bf16.vlgmr.msra.gmra.mrb[16].mxu1 %vm754_vm2, %v1437_v6 }
 0x259   : > { %3310 = vmatprep.mubr.msk.bf16.mxu0 %vm3758_vm0, %v3757_v0  ;;  %3316 = vmatprep.mubr.msk.bf16.mxu1 %vm3758_vm0, %v3757_v0 }
 0x313   : > { %v4298_v7 = vpop.f32.mrb[4].mxu0  ;;  %v4300_v19 = vpop.f32.mrb[4].mxu1 }
 0x314   : > { %v3264_v1 = vpop.f32.mrb[5].mxu0  ;;  %v3270_v2 = vpop.f32.mrb[5].mxu1  ;;  %v1812_v20 = vsel %vm751_vm4, %v4300_v19, -inf  ;;  %v1809_v9 = vsel %vm751_vm4, %v4298_v7, -inf }
 0x315   : > { %1813 = vmax.xlane.f32.xlu1 %v1812_v20  ;;  %v1528_v10 = vpop.f32.mrb[6].mxu1  ;;  %1810 = vmax.xlane.f32.xlu0 %v1809_v9  ;;  %v1482_v22 = vpop.f32.mrb[6].mxu0 }
 0x316   : > { %v3265_v3 = vpop.f32.mrb[7].mxu0  ;;  %v3271_v4 = vpop.f32.mrb[7].mxu1 }
 0x317   : > { %v4355_v4 = vld [vmem:[#allocation3] sm:$0xff] }
 0x31b   : > { %v4306_v5 = vpop.f32.mrb[8].mxu0  ;;  %v4308_v11 = vpop.f32.mrb[8].mxu1 }
 0x31c   : > { %v3276_v12 = vpop.f32.mrb[9].mxu0  ;;  %v3282_v13 = vpop.f32.mrb[9].mxu1  ;;  %v1815_v14 = vsel %vm751_vm4, %v4306_v5, -inf  ;;  %v1818_v26 = vsel %vm751_vm4, %v4308_v11, -inf }
 0x31d   : > { %v1620_v15 = vpop.f32.mrb[10].mxu1  ;;  %1816 = vmax.xlane.f32.xlu0 %v1815_v14  ;;  %v1574_v16 = vpop.f32.mrb[10].mxu0  ;;  %v4360_v14 = vsub.s32 1, %v4118_v21 }
 0x31e   : > { %v3277_v23 = vpop.f32.mrb[11].mxu0  ;;  %v3283_v24 = vpop.f32.mrb[11].mxu1  ;;  %v4363_v15 = vsub.s32 0, %v4118_v21 }
 0x321   : > { %1819 = vmax.xlane.f32.xlu0 %v1818_v26 }
 0x323   : > { %v4314_v27 = vpop.f32.mrb[12].mxu0  ;;  %v4316_v29 = vpop.f32.mrb[12].mxu1 }
 0x324   : > { %v3288_v30 = vpop.f32.mrb[13].mxu0  ;;  %v3294_v31 = vpop.f32.mrb[13].mxu1  ;;  %v1824_v33 = vsel %vm751_vm4, %v4316_v29, -inf  ;;  %v1821_v36 = vsel %vm751_vm4, %v4314_v27, -inf }
 0x325   : > { %v1712_v39 = vpop.f32.mrb[14].mxu1  ;;  %1825 = vmax.xlane.f32.xlu0 %v1824_v33  ;;  %1822 = vmax.xlane.f32.xlu1 %v1821_v36  ;;  %v1666_v40 = vpop.f32.mrb[14].mxu0  ;;  %v4378_v36 = vsub.s32 3, %v4118_v21 }
 0x326   : > { %v3289_v41 = vpop.f32.mrb[15].mxu0  ;;  %v3295_v42 = vpop.f32.mrb[15].mxu1 }
 0x32b   : > { %v4322_v43 = vpop.f32.mrb[16].mxu0  ;;  %v4324_v44 = vpop.f32.mrb[16].mxu1 }
 0x32c   : > { %v3300_v45 = vpop.f32.mrb[17].mxu0  ;;  %v3306_v46 = vpop.f32.mrb[17].mxu1  ;;  %v1830_v47 = vsel %vm751_vm4, %v4324_v44, -inf  ;;  %v1827_v48 = vsel %vm751_vm4, %v4322_v43, -inf }
 0x32d   : > { %v1804_v49 = vpop.f32.mrb[18].mxu1  ;;  %1831 = vmax.xlane.f32.xlu0 %v1830_v47  ;;  %1828 = vmax.xlane.f32.xlu1 %v1827_v48  ;;  %v1758_v50 = vpop.f32.mrb[18].mxu0  ;;  %v4381_v45 = vsub.s32 2, %v4118_v21 }
 0x32e   : > { %v3301_v51 = vpop.f32.mrb[19].mxu0  ;;  %v3307_v52 = vpop.f32.mrb[19].mxu1 }
 0x33e   : > { %1126 = vrot.lane.b32.xlu1 %v4092_v8, %s3769_s4 }
 0x342   : > { %1130 = vrot.lane.b32.xlu1 %v4134_v38, %s3769_s4 }
 0x343   : > { %1128 = vrot.lane.b32.xlu0 %v4123_v28, %s3769_s4 }
 0x346   : > { %1132 = vrot.lane.b32.xlu1 %v4132_v37, %s3769_s4 }
 0x3a2   : > { %v1811_v56 = vpop.xlane.xlu0 %1810  ;;  %v1814_v60 = vpop.xlane.xlu1 %1813 }
 0x3a3   : > { %v1850_v8 = vrot.slane %v1814_v60, %v4341_v59  ;;  %v1846_v61 = vrot.slane %v1811_v56, %v4341_v59 }
 0x3a5   : > { %v1876_v63 = vsel %vm1875_vm5, %v1850_v8, %v1846_v61 }
 0x3aa   : > { %v1817_v58 = vpop.xlane.xlu0 %1816 }
 0x3ab   : > { %v1854_v28 = vrot.slane %v1817_v58, %v4341_v59 }
 0x3ad   : > { %v1878_v6 = vsel %vm1877_vm6, %v1854_v28, %v1876_v63 }
 0x3ae   : > { %v1820_v18 = vpop.xlane.xlu0 %1819 }
 0x3af   : > { %v1858_v37 = vrot.slane %v1820_v18, %v4341_v59 }
 0x3b1   : > { %v1880_v1 = vsel %vm1879_vm7, %v1858_v37, %v1878_v6  ;;  %v4412_v6 = vsub.s32 7, %v4118_v21 }
 0x3b2   : > { %v1823_v38 = vpop.xlane.xlu1 %1822  ;;  %v1826_v62 = vpop.xlane.xlu0 %1825 }
 0x3b3   : > { %v1862_v17 = vrot.slane %v1823_v38, %v4341_v59  ;;  %v1866_v2 = vrot.slane %v1826_v62, %v4341_v59  ;;  %v4403_v38 = vsub.s32 4, %v4118_v21 }
 0x3b5   : > { %v1882_v20 = vsel %vm1881_vm8, %v1862_v17, %v1880_v1 }
 0x3b6   : > { %v1884_v12 = vsel %vm1883_vm9, %v1866_v2, %v1882_v20 }
 0x3ba   : > { %v1832_v9 = vpop.xlane.xlu0 %1831  ;;  %v1829_v10 = vpop.xlane.xlu1 %1828 }
 0x3bb   : > { %v1874_v22 = vrot.slane %v1832_v9, %v4341_v59  ;;  %v1870_v3 = vrot.slane %v1829_v10, %v4341_v59  ;;  %v4421_v10 = vsub.s32 6, %v4118_v21 }
 0x3bd   : > { %v1886_v13 = vsel %vm1885_vm10, %v1870_v3, %v1884_v12 }
 0x3be   : > { %v1888_v16 = vsel %vm1887_vm11, %v1874_v22, %v1886_v13  ;;  %v1127_v23 = vpop.permute.xlu1 %1126  ;;  %v1129_v41 = vpop.permute.xlu0 %1128 }
 0x3bf   : > { %v4367_v24 = vmax.f32 %v4355_v4, %v1888_v16 }
 0x3c1   : > { %v1891_v26 = vsub.f32 %v4355_v4, %v4367_v24  ;;  %2515 = vst.msk [vmem:[#allocation3] sm:$0xff] %vm751_vm4, %v4367_v24  ;;  %v1904_v30 = vrot.slane %v4367_v24, %v4360_v14  ;;  %v1897_v31 = vrot.slane %v4367_v24, %v4363_v15  ;;  %v1918_v48 = vrot.slane %v4367_v24, %v4378_v36 }
 0x3c2   : > { %v1131_v33 = vpop.permute.xlu1 %1130  ;;  %v1911_v53 = vrot.slane %v4367_v24, %v4381_v45  ;;  %v1946_v13 = vrot.slane %v4367_v24, %v4412_v6 }
 0x3c3   : > { %1906 = vbcast.lane.b32.xlu1 %v1904_v30, 256  ;;  %1899 = vbcast.lane.b32.xlu0 %v1897_v31, 256  ;;  %v1150_v39 = vcombine.low %v1127_v23, %v1131_v33  ;;  %v1151_v40 = vcombine.high %v1127_v23, %v1131_v33 }
 0x3c5   : > { %v1158_v49 = vrot.slane %v1150_v39, %v4121_v25  ;;  %v1165_v50 = vrot.slane %v1151_v40, %v4121_v25 }
 0x3c6   : > { %v1133_v42 = vpop.permute.xlu1 %1132 }
 0x3c7   : > { %v1166_v46 = vcombine.low %v1129_v41, %v1133_v42  ;;  %v1167_v47 = vcombine.high %v1129_v41, %v1133_v42  ;;  %1136 = vrot.lane.b32.xlu1 %v4180_v34, %s3769_s4  ;;  %1134 = vrot.lane.b32.xlu0 %v4182_v35, %s3769_s4  ;;  %v4396_v35 = vsub.s32 5, %v4118_v21  ;;  %v1939_v21 = vrot.slane %v4367_v24, %v4421_v10 }
 0x3c9   : > { %v1174_v51 = vrot.slane %v1166_v46, %v4121_v25  ;;  %v1181_v52 = vrot.slane %v1167_v47, %v4121_v25  ;;  %v1932_v63 = vrot.slane %v4367_v24, %v4396_v35 }
 0x3cb   : > { %v1214_v56 = vcombine.low %v1158_v49, %v1174_v51  ;;  %v1215_v57 = vcombine.high %v1158_v49, %v1174_v51  ;;  %v1230_v34 = vcombine.low %v1165_v50, %v1181_v52  ;;  %v1231_v58 = vcombine.high %v1165_v50, %v1181_v52  ;;  %1920 = vbcast.lane.b32.xlu1 %v1918_v48, 256 }
 0x3cc   : > { %1913 = vbcast.lane.b32.xlu0 %v1911_v53, 256 }
 0x3cd   : > { %v1222_v60 = vrot.slane %v1214_v56, %v4126_v32  ;;  %v1229_v18 = vrot.slane %v1215_v57, %v4126_v32  ;;  %v1238_v8 = vrot.slane %v1230_v34, %v4126_v32  ;;  %v1245_v61 = vrot.slane %v1231_v58, %v4126_v32 }
 0x3cf   : > { %v3163_v28 = vcombine.low %v1222_v60, %v1229_v18  ;;  %v3165_v37 = vcombine.high %v1222_v60, %v1229_v18  ;;  %v3167_v62 = vcombine.low %v1238_v8, %v1245_v61  ;;  %v3169_v17 = vcombine.high %v1238_v8, %v1245_v61  ;;  %1140 = vrot.lane.b32.xlu1 %v4188_v54, %s3769_s4 }
 0x3d0   : > { %1138 = vrot.lane.b32.xlu0 %v4190_v55, %s3769_s4  ;;  %v1925_v54 = vrot.slane %v4367_v24, %v4403_v38  ;;  %s3777_s4 = smov [#allocation15]  }
 0x3d1   : > { %v1294_v1 = vrot.slane %v3163_v28, %v4121_v25  ;;  %v1310_v2 = vrot.slane %v3165_v37, %v4121_v25  ;;  %v1326_v20 = vrot.slane %v3167_v62, %v4121_v25  ;;  %v1342_v9 = vrot.slane %v3169_v17, %v4121_v25 }
 0x3d3   : > { %1934 = vbcast.lane.b32.xlu1 %v1932_v63, 256  ;;  %v1350_v55 = vcombine.low %v1294_v1, %v1310_v2  ;;  %v1382_v22 = vcombine.low %v1326_v20, %v1342_v9  ;;  %v1351_v3 = vcombine.high %v1294_v1, %v1310_v2  ;;  %v1383_v12 = vcombine.high %v1326_v20, %v1342_v9 }
 0x3d4   : > { %1927 = vbcast.lane.b32.xlu0 %v1925_v54, 256 }
 0x3d5   : > { %v1358_v16 = vrot.slane %v1350_v55, %v4126_v32  ;;  %v1390_v23 = vrot.slane %v1382_v22, %v4126_v32  ;;  %v1365_v30 = vrot.slane %v1351_v3, %v4126_v32  ;;  %v1397_v31 = vrot.slane %v1383_v12, %v4126_v32 }
 0x3d7   : > { %1948 = vbcast.lane.b32.xlu1 %v1946_v13, 256  ;;  %v1414_v33 = vcombine.low %v1358_v16, %v1390_v23  ;;  %v1415_v39 = vcombine.high %v1358_v16, %v1390_v23  ;;  %v1416_v40 = vcombine.low %v1365_v30, %v1397_v31  ;;  %v1417_v41 = vcombine.high %v1365_v30, %v1397_v31 }
 0x3d8   : > { %1941 = vbcast.lane.b32.xlu0 %v1939_v21, 256 }
 0x3d9   : > { %v1422_v42 = vpack.c.bf16 %v1414_v33, %v1414_v33  ;;  %v1423_v46 = vpack.c.bf16 %v1415_v39, %v1415_v39  ;;  %v1424_v9 = vpack.c.bf16 %v1416_v40, %v1416_v40  ;;  %v1425_v54 = vpack.c.bf16 %v1417_v41, %v1417_v41 }
 0x3db   : > { %v2063_v47 = vsel %vm2061_vm12, %v1422_v42, 0  ;;  %v2109_v48 = vsel %vm2061_vm12, %v1423_v46, 0  ;;  %v2155_v42 = vsel %vm2061_vm12, %v1424_v9, 0 }
 0x3dc   : > { %3309 = vmatpush3.bf16.msra.mxu0 %v2063_v47  ;;  %3315 = vmatpush3.bf16.msra.mxu1 %v2109_v48 }
 0x3dd   : > { %3320 = vmatprep.subr.bf16.mxu0 %v3757_v0  ;;  %3326 = vmatprep.subr.bf16.mxu1 %v3757_v0 }
 0x435   : > { %v1900_v49 = vpop.permute.xlu0 %1899  ;;  %v1907_v50 = vpop.permute.xlu1 %1906 }
 0x436   : > { %v1950_v51 = vsub.f32 %v4298_v7, %v1900_v49  ;;  %v1951_v52 = vsub.f32 %v4300_v19, %v1907_v50 }
 0x438   : > { %v1958_v53 = vmul.f32 1.442695, %v1950_v51  ;;  %v1960_v56 = vmul.f32 1.442695, %v1951_v52 }
 0x439   : > { %v1135_v57 = vpop.permute.xlu0 %1134  ;;  %v1137_v34 = vpop.permute.xlu1 %1136 }
 0x43a   : > { %3490 = vpow2.f32 %v1958_v53 }
 0x43b   : > { %3492 = vpow2.f32 %v1960_v56 }
 0x43d   : > { %v1921_v58 = vpop.permute.xlu1 %1920 }
 0x43e   : > { %v1914_v60 = vpop.permute.xlu0 %1913  ;;  %v1953_v18 = vsub.f32 %v4308_v11, %v1921_v58 }
 0x43f   : > { %v1952_v8 = vsub.f32 %v4306_v5, %v1914_v60 }
 0x440   : > { %v1964_v61 = vmul.f32 1.442695, %v1953_v18 }
 0x441   : > { %v1962_v28 = vmul.f32 1.442695, %v1952_v8  ;;  %v1141_v37 = vpop.permute.xlu1 %1140 }
 0x442   : > { %3494 = vpow2.f32 %v1964_v61  ;;  %v1139_v62 = vpop.permute.xlu0 %1138  ;;  %v1198_v7 = vcombine.low %v1137_v34, %v1141_v37  ;;  %v1199_v17 = vcombine.high %v1137_v34, %v1141_v37 }
 0x443   : > { %3496 = vpow2.f32 %v1962_v28  ;;  %v1182_v19 = vcombine.low %v1135_v57, %v1139_v62  ;;  %v1183_v63 = vcombine.high %v1135_v57, %v1139_v62 }
 0x444   : > { %v3491_v1 = vpop.eup %3490  ;;  %v1206_v2 = vrot.slane %v1198_v7, %v4121_v25  ;;  %v1213_v20 = vrot.slane %v1199_v17, %v4121_v25 }
 0x445   : > { %v3493_v11 = vpop.eup %3492  ;;  %v1190_v5 = vrot.slane %v1182_v19, %v4121_v25  ;;  %v1197_v55 = vrot.slane %v1183_v63, %v4121_v25  ;;  %v1935_v22 = vpop.permute.xlu1 %1934  ;;  %v1976_v3 = vsel %vm751_vm4, %v3491_v1, 0.0  ;;  %v2050_v12 = vpack.c.bf16 %v3491_v1, %v3491_v1 }
 0x446   : > { %v1928_v13 = vpop.permute.xlu0 %1927  ;;  %v1955_v16 = vsub.f32 %v4316_v29, %v1935_v22  ;;  %1977 = vadd.xlane.f32.xlu0 %v1976_v3  ;;  %v1979_v23 = vsel %vm751_vm4, %v3493_v11, 0.0  ;;  %v2051_v30 = vpack.c.bf16 %v3493_v11, %v3493_v11  ;;  %v2201_v29 = vsel %vm2061_vm12, %v1425_v54, 0 }
 0x447   : > { %v1246_v31 = vcombine.low %v1190_v5, %v1206_v2  ;;  %v1247_v21 = vcombine.high %v1190_v5, %v1206_v2  ;;  %v1262_v33 = vcombine.low %v1197_v55, %v1213_v20  ;;  %v1263_v39 = vcombine.high %v1197_v55, %v1213_v20  ;;  %1980 = vadd.xlane.f32.xlu1 %v1979_v23 }
 0x448   : > { %v1954_v40 = vsub.f32 %v4314_v27, %v1928_v13  ;;  %v1968_v41 = vmul.f32 1.442695, %v1955_v16  ;;  %3311 = vmatmul.mubr.msk.bf16.vlgmr.msra.gmra.mrb[20].mxu0 %vm751_vm4, %v2050_v12  ;;  %3317 = vmatmul.mubr.msk.bf16.vlgmr.msra.gmra.mrb[20].mxu1 %vm751_vm4, %v2051_v30 }
 0x449   : > { %v1254_v46 = vrot.slane %v1246_v31, %v4126_v32  ;;  %v1261_v47 = vrot.slane %v1247_v21, %v4126_v32  ;;  %v1270_v48 = vrot.slane %v1262_v33, %v4126_v32  ;;  %v1277_v49 = vrot.slane %v1263_v39, %v4126_v32  ;;  %3321 = vmatpush3.bf16.msra.mxu0 %v2155_v42  ;;  %v1949_v50 = vpop.permute.xlu1 %1948 }
 0x44a   : > { %v1966_v27 = vmul.f32 1.442695, %v1954_v40  ;;  %3498 = vpow2.f32 %v1968_v41  ;;  %3327 = vmatpush3.bf16.msra.mxu1 %v2201_v29  ;;  %v1942_v51 = vpop.permute.xlu0 %1941  ;;  %v1957_v52 = vsub.f32 %v4324_v44, %v1949_v50  ;;  %3322 = vmatprep.mubr.msk.bf16.mxu0 %vm3758_vm0, %v3757_v0 }
 0x44b   : > { %v3164_v53 = vcombine.low %v1254_v46, %v1261_v47  ;;  %v3166_v56 = vcombine.high %v1254_v46, %v1261_v47  ;;  %v3168_v57 = vcombine.low %v1270_v48, %v1277_v49  ;;  %v3170_v34 = vcombine.high %v1270_v48, %v1277_v49  ;;  %3328 = vmatprep.mubr.msk.bf16.mxu1 %vm3758_vm0, %v3757_v0 }
 0x44c   : > { %v3495_v58 = vpop.eup %3494  ;;  %3500 = vpow2.f32 %v1966_v27  ;;  %v1956_v60 = vsub.f32 %v4322_v43, %v1942_v51  ;;  %v1972_v18 = vmul.f32 1.442695, %v1957_v52  ;;  %3332 = vmatprep.subr.bf16.mxu0 %v3757_v0  ;;  %3338 = vmatprep.subr.bf16.mxu1 %v3757_v0  ;;  %v1892_v48 = vmul.f32 1.442695, %v1891_v26 }
 0x44d   : > { %v3497_v44 = vpop.eup %3496  ;;  %v1301_v8 = vrot.slane %v3164_v53, %v4121_v25  ;;  %v1317_v61 = vrot.slane %v3166_v56, %v4121_v25  ;;  %v1333_v28 = vrot.slane %v3168_v57, %v4121_v25  ;;  %v1349_v37 = vrot.slane %v3170_v34, %v4121_v25 }
 0x44e   : > { %v1970_v62 = vmul.f32 1.442695, %v1956_v60  ;;  %3502 = vpow2.f32 %v1972_v18  ;;  %v1982_v7 = vsel %vm751_vm4, %v3497_v44, 0.0  ;;  %v2052_v17 = vpack.c.bf16 %v3497_v44, %v3497_v44 }
 0x44f   : > { %1983 = vadd.xlane.f32.xlu0 %v1982_v7  ;;  %v2053_v43 = vpack.c.bf16 %v3495_v58, %v3495_v58  ;;  %v1366_v19 = vcombine.low %v1301_v8, %v1317_v61  ;;  %v1398_v63 = vcombine.low %v1333_v28, %v1349_v37  ;;  %v1367_v1 = vcombine.high %v1301_v8, %v1317_v61 }
 0x450   : > { %3504 = vpow2.f32 %v1970_v62  ;;  %3323 = vmatmul.mubr.msk.bf16.vlgmr.msra.gmra.mrb[24].mxu0 %vm751_vm4, %v2052_v17  ;;  %v1399_v2 = vcombine.high %v1333_v28, %v1349_v37  ;;  %v1985_v54 = vsel %vm751_vm4, %v3495_v58, 0.0 }
 0x451   : > { %3329 = vmatmul.mubr.msk.bf16.vlgmr.msra.gmra.mrb[24].mxu1 %vm751_vm4, %v2053_v43  ;;  %v1374_v20 = vrot.slane %v1366_v19, %v4126_v32  ;;  %v1406_v9 = vrot.slane %v1398_v63, %v4126_v32  ;;  %3334 = vmatprep.mubr.msk.bf16.mxu0 %vm3758_vm0, %v3757_v0  ;;  %v1381_v11 = vrot.slane %v1367_v1, %v4126_v32  ;;  %3506 = vpow2.f32 %v1892_v48 }
 0x452   : > { %3340 = vmatprep.mubr.msk.bf16.mxu1 %vm3758_vm0, %v3757_v0  ;;  %v1413_v5 = vrot.slane %v1399_v2, %v4126_v32 }
 0x453   : > { %1986 = vadd.xlane.f32.xlu0 %v1985_v54  ;;  %v1418_v55 = vcombine.low %v1374_v20, %v1406_v9  ;;  %v1419_v22 = vcombine.high %v1374_v20, %v1406_v9 }
 0x454   : > { %v3499_v3 = vpop.eup %3498  ;;  %v1420_v12 = vcombine.low %v1381_v11, %v1413_v5  ;;  %v1421_v13 = vcombine.high %v1381_v11, %v1413_v5 }
 0x455   : > { %v1991_v16 = vsel %vm751_vm4, %v3499_v3, 0.0  ;;  %v1426_v23 = vpack.c.bf16 %v1418_v55, %v1418_v55  ;;  %v1427_v30 = vpack.c.bf16 %v1419_v22, %v1419_v22  ;;  %v2055_v49 = vpack.c.bf16 %v3499_v3, %v3499_v3  ;;  %v1974_v55 = vld [vmem:[#allocation4] sm:$0xff] }
 0x456   : > { %v3501_v31 = vpop.eup %3500  ;;  %v1428_v41 = vpack.c.bf16 %v1420_v12, %v1420_v12  ;;  %v1429_v42 = vpack.c.bf16 %v1421_v13, %v1421_v13 }
 0x457   : > { %v1988_v21 = vsel %vm751_vm4, %v3501_v31, 0.0  ;;  %1992 = vadd.xlane.f32.xlu0 %v1991_v16  ;;  %v2247_v33 = vsel %vm2061_vm12, %v1426_v23, 0  ;;  %v2293_v39 = vsel %vm2061_vm12, %v1427_v30, 0  ;;  %v2054_v29 = vpack.c.bf16 %v3501_v31, %v3501_v31 }
 0x458   : > { %v3503_v40 = vpop.eup %3502  ;;  %1989 = vadd.xlane.f32.xlu1 %v1988_v21  ;;  %3333 = vmatpush3.bf16.msra.mxu0 %v2247_v33  ;;  %v2339_v27 = vsel %vm2061_vm12, %v1428_v41, 0  ;;  %v2385_v51 = vsel %vm2061_vm12, %v1429_v42, 0 }
 0x459   : > { %3339 = vmatpush3.bf16.msra.mxu1 %v2293_v39  ;;  %3344 = vmatprep.subr.bf16.mxu0 %v3757_v0  ;;  %v1997_v46 = vsel %vm751_vm4, %v3503_v40, 0.0  ;;  %v2057_v24 = vpack.c.bf16 %v3503_v40, %v3503_v40 }
 0x45a   : > { %v3505_v47 = vpop.eup %3504  ;;  %3350 = vmatprep.subr.bf16.mxu1 %v3757_v0 }
 0x45b   : > { %v1994_v50 = vsel %vm751_vm4, %v3505_v47, 0.0  ;;  %3335 = vmatmul.mubr.msk.bf16.vlgmr.msra.gmra.mrb[28].mxu0 %vm751_vm4, %v2054_v29  ;;  %1998 = vadd.xlane.f32.xlu0 %v1997_v46  ;;  %v2056_v4 = vpack.c.bf16 %v3505_v47, %v3505_v47  ;;  %v3507_v26 = vpop.eup %3506  ;;  %v2484_v46 = vld [vmem:[#allocation5 + $0x8] sm:$0xff] }
 0x45c   : > { %1995 = vadd.xlane.f32.xlu1 %v1994_v50  ;;  %3341 = vmatmul.mubr.msk.bf16.vlgmr.msra.gmra.mrb[28].mxu1 %vm751_vm4, %v2055_v49  ;;  %v2430_v52 = vrot.slane %v3507_v26, %v4363_v15  ;;  %v2444_v53 = vrot.slane %v3507_v26, %v4381_v45  ;;  %v2437_v56 = vrot.slane %v3507_v26, %v4360_v14 }
 0x45d   : > { %3345 = vmatpush3.bf16.msra.mxu0 %v2339_v27  ;;  %3351 = vmatpush3.bf16.msra.mxu1 %v2385_v51  ;;  %v2451_v57 = vrot.slane %v3507_v26, %v4378_v36  ;;  %v2458_v34 = vrot.slane %v3507_v26, %v4403_v38  ;;  %v2465_v58 = vrot.slane %v3507_v26, %v4396_v35 }
 0x45e   : > { %3346 = vmatprep.mubr.msk.bf16.mxu0 %vm3758_vm0, %v3757_v0  ;;  %3352 = vmatprep.mubr.msk.bf16.mxu1 %vm3758_vm0, %v3757_v0  ;;  %v2472_v60 = vrot.slane %v3507_v26, %v4421_v10  ;;  %v2479_v18 = vrot.slane %v3507_v26, %v4412_v6  ;;  %v1975_v13 = vmul.f32 %v3507_v26, %v1974_v55 }
 0x45f   : > { %3356 = vmatprep.subr.bf16.mxu0 %v3757_v0 }
 0x463   : > { %3347 = vmatmul.mubr.msk.bf16.vlgmr.msra.gmra.mrb[32].mxu0 %vm751_vm4, %v2056_v4 }
 0x464   : > { %3353 = vmatmul.mubr.msk.bf16.vlgmr.msra.gmra.mrb[32].mxu1 %vm751_vm4, %v2057_v24  ;;  %3360 = vmatprep.mubr.msk.bf16.mxu0 %vm3758_vm0, %v3757_v0  ;;  %vm2901_vm0 = vcmask 195584  }
 0x46d   : > { %2432 = vbcast.lane.b32.xlu1 %v2430_v52, 256  ;;  %v2485_v52 = vld [vmem:[#allocation5 + $0x10] sm:$0xff] }
 0x471   : > { %2446 = vbcast.lane.b32.xlu1 %v2444_v53, 256  ;;  %2439 = vbcast.lane.b32.xlu0 %v2437_v56, 256  ;;  %v2486_v53 = vld [vmem:[#allocation5 + $0x18] sm:$0xff] }
 0x475   : > { %2453 = vbcast.lane.b32.xlu1 %v2451_v57, 256  ;;  %2460 = vbcast.lane.b32.xlu0 %v2458_v34, 256 }
 0x479   : > { %2467 = vbcast.lane.b32.xlu1 %v2465_v58, 256  ;;  %2474 = vbcast.lane.b32.xlu0 %v2472_v60, 256 }
 0x47d   : > { %2481 = vbcast.lane.b32.xlu1 %v2479_v18, 256 }
 0x4d3   : > { %v1978_v44 = vpop.xlane.xlu0 %1977 }
 0x4d4   : > { %v1981_v61 = vpop.xlane.xlu1 %1980  ;;  %v2011_v37 = vrot.slane %v1978_v44, %v4341_v59 }
 0x4d5   : > { %v2015_v62 = vrot.slane %v1981_v61, %v4341_v59 }
 0x4d7   : > { %v2040_v19 = vsel %vm1875_vm5, %v2015_v62, %v2011_v37 }
 0x4dc   : > { %v1984_v8 = vpop.xlane.xlu0 %1983 }
 0x4dd   : > { %v2019_v7 = vrot.slane %v1984_v8, %v4341_v59 }
 0x4df   : > { %v2041_v1 = vsel %vm1877_vm6, %v2019_v7, %v2040_v19  ;;  %v2488_v19 = vld [vmem:[#allocation5 + $0x28] sm:$0xff] }
 0x4e0   : > { %v1987_v28 = vpop.xlane.xlu0 %1986 }
 0x4e1   : > { %v2023_v17 = vrot.slane %v1987_v28, %v4341_v59 }
 0x4e3   : > { %v2042_v20 = vsel %vm1879_vm7, %v2023_v17, %v2041_v1  ;;  %v2487_v17 = vld [vmem:[#allocation5 + $0x20] sm:$0xff] }
 0x4e4   : > { %v1993_v43 = vpop.xlane.xlu0 %1992 }
 0x4e5   : > { %v1990_v63 = vpop.xlane.xlu1 %1989  ;;  %v2031_v9 = vrot.slane %v1993_v43, %v4341_v59 }
 0x4e6   : > { %v2027_v2 = vrot.slane %v1990_v63, %v4341_v59 }
 0x4e8   : > { %v2043_v54 = vsel %vm1881_vm8, %v2027_v2, %v2042_v20  ;;  %v1999_v11 = vpop.xlane.xlu0 %1998 }
 0x4e9   : > { %v2039_v5 = vrot.slane %v1999_v11, %v4341_v59  ;;  %v1996_v22 = vpop.xlane.xlu1 %1995  ;;  %v2044_v12 = vsel %vm1883_vm9, %v2031_v9, %v2043_v54 }
 0x4ea   : > { %v2035_v3 = vrot.slane %v1996_v22, %v4341_v59 }
 0x4ec   : > { %v2045_v16 = vsel %vm1885_vm10, %v2035_v3, %v2044_v12  ;;  %v2440_v47 = vpop.permute.xlu0 %2439 }
 0x4ed   : > { %v2046_v23 = vsel %vm1887_vm11, %v2039_v5, %v2045_v16  ;;  %v2492_v48 = vmul.f32 %v2484_v46, %v2440_v47 }
 0x4ee   : > { %v2048_v30 = vadd.f32 %v2046_v23, %v1975_v13  ;;  %v2489_v13 = vld [vmem:[#allocation5 + $0x30] sm:$0xff] }
 0x4f0   : > { %2049 = vst.msk [vmem:[#allocation4] sm:$0xff] %vm751_vm4, %v2048_v30  ;;  %v2461_v43 = vpop.permute.xlu0 %2460  ;;  %v2490_v30 = vld [vmem:[#allocation5 + $0x38] sm:$0xff] }
 0x4f1   : > { %v2495_v1 = vmul.f32 %v2487_v17, %v2461_v43 }
 0x4f4   : > { %v2475_v16 = vpop.permute.xlu0 %2474 }
 0x4f7   : > { %v2527_v31 = vld [vmem:[#allocation4] sm:$0xff] }
 0x4f8   : > { %3508 = vrcp.f32 %v2527_v31 }
 0x502   : > { %v3509_v21 = vpop.eup %3508 }
 0x503   : > { %v2539_v33 = vrot.slane %v3509_v21, %v4360_v14  ;;  %v2532_v39 = vrot.slane %v3509_v21, %v4363_v15  ;;  %v2553_v59 = vrot.slane %v3509_v21, %v4378_v36  ;;  %v2546_v40 = vrot.slane %v3509_v21, %v4381_v45  ;;  %v2433_v15 = vpop.permute.xlu1 %2432  ;;  %v2483_v36 = vld [vmem:[#allocation5] sm:$0xff] }
 0x504   : > { %v2567_v41 = vrot.slane %v3509_v21, %v4396_v35  ;;  %v2560_v42 = vrot.slane %v3509_v21, %v4403_v38  ;;  %v2581_v29 = vrot.slane %v3509_v21, %v4412_v6  ;;  %v2574_v14 = vrot.slane %v3509_v21, %v4421_v10 }
 0x505   : > { %2541 = vbcast.lane.b32.xlu1 %v2539_v33, 256  ;;  %2534 = vbcast.lane.b32.xlu0 %v2532_v39, 256  ;;  %v2491_v45 = vmul.f32 %v2483_v36, %v2433_v15  ;;  %v2497_v21 = vmul.f32 %v2489_v13, %v2475_v16 }
 0x507   : > { %v2447_v49 = vpop.permute.xlu1 %2446 }
 0x508   : > { %v2493_v57 = vmul.f32 %v2485_v52, %v2447_v49 }
 0x509   : > { %2555 = vbcast.lane.b32.xlu1 %v2553_v59, 256  ;;  %2548 = vbcast.lane.b32.xlu0 %v2546_v40, 256 }
 0x50b   : > { %v2454_v56 = vpop.permute.xlu1 %2453 }
 0x50c   : > { %v2494_v34 = vmul.f32 %v2486_v53, %v2454_v56 }
 0x50d   : > { %2569 = vbcast.lane.b32.xlu1 %v2567_v41, 256  ;;  %2562 = vbcast.lane.b32.xlu0 %v2560_v42, 256 }
 0x50f   : > { %v2468_v63 = vpop.permute.xlu1 %2467 }
 0x510   : > { %v2496_v2 = vmul.f32 %v2488_v19, %v2468_v63 }
 0x511   : > { %2583 = vbcast.lane.b32.xlu1 %v2581_v29, 256  ;;  %2576 = vbcast.lane.b32.xlu0 %v2574_v14, 256 }
 0x513   : > { %v2482_v31 = vpop.permute.xlu1 %2481 }
 0x514   : > { %v2498_v33 = vmul.f32 %v2490_v30, %v2482_v31 }
 0x51b   : > { %v2099_v50 = vpop.f32.mrb[20].mxu0  ;;  %v2145_v27 = vpop.f32.mrb[20].mxu1 }
 0x51c   : > { %v2499_v35 = vadd.f32 %v2491_v45, %v2099_v50  ;;  %v2500_v51 = vadd.f32 %v2492_v48, %v2145_v27  ;;  %v3312_v38 = vpop.f32.mrb[21].mxu0  ;;  %v3318_v4 = vpop.f32.mrb[21].mxu1 }
 0x51d   : > { %v2102_v24 = vpop.f32.mrb[22].mxu0  ;;  %v2148_v26 = vpop.f32.mrb[22].mxu1 }
 0x51e   : > { %2507 = vst.msk [vmem:[#allocation5] sm:$0xff] %vm754_vm2, %v2499_v35  ;;  %2508 = vst.msk [vmem:[#allocation5 + $0x8] sm:$0xff] %vm754_vm2, %v2500_v51  ;;  %v3313_v6 = vpop.f32.mrb[23].mxu0  ;;  %v3319_v10 = vpop.f32.mrb[23].mxu1 }
 0x523   : > { %v2191_v58 = vpop.f32.mrb[24].mxu0 }
 0x524   : > { %v2501_v60 = vadd.f32 %v2493_v57, %v2191_v58  ;;  %v2237_v18 = vpop.f32.mrb[24].mxu1  ;;  %v3324_v44 = vpop.f32.mrb[25].mxu0 }
 0x525   : > { %v2502_v8 = vadd.f32 %v2494_v34, %v2237_v18  ;;  %v3330_v61 = vpop.f32.mrb[25].mxu1  ;;  %v2194_v28 = vpop.f32.mrb[26].mxu0  ;;  %v2519_v45 = vld [vmem:[#allocation5] sm:$0xff]  ;;  %v2520_v49 = vld [vmem:[#allocation5 + $0x8] sm:$0xff] }
 0x526   : > { %2509 = vst.msk [vmem:[#allocation5 + $0x10] sm:$0xff] %vm754_vm2, %v2501_v60  ;;  %v2240_v37 = vpop.f32.mrb[26].mxu1  ;;  %v3325_v62 = vpop.f32.mrb[27].mxu0 }
 0x527   : > { %2510 = vst.msk [vmem:[#allocation5 + $0x18] sm:$0xff] %vm754_vm2, %v2502_v8  ;;  %v3331_v7 = vpop.f32.mrb[27].mxu1 }
 0x52d   : > { %v2521_v27 = vld [vmem:[#allocation5 + $0x10] sm:$0xff] }
 0x52e   : > { %v2283_v20 = vpop.f32.mrb[28].mxu0  ;;  %v2522_v35 = vld [vmem:[#allocation5 + $0x18] sm:$0xff] }
 0x52f   : > { %v2503_v9 = vadd.f32 %v2495_v1, %v2283_v20  ;;  %v2329_v54 = vpop.f32.mrb[28].mxu1  ;;  %v3336_v11 = vpop.f32.mrb[29].mxu0 }
 0x530   : > { %v2504_v5 = vadd.f32 %v2496_v2, %v2329_v54  ;;  %v3342_v55 = vpop.f32.mrb[29].mxu1  ;;  %v2286_v22 = vpop.f32.mrb[30].mxu0 }
 0x531   : > { %2511 = vst.msk [vmem:[#allocation5 + $0x20] sm:$0xff] %vm754_vm2, %v2503_v9  ;;  %v2332_v3 = vpop.f32.mrb[30].mxu1  ;;  %v3337_v12 = vpop.f32.mrb[31].mxu0 }
 0x532   : > { %2512 = vst.msk [vmem:[#allocation5 + $0x28] sm:$0xff] %vm754_vm2, %v2504_v5  ;;  %v3343_v23 = vpop.f32.mrb[31].mxu1 }
 0x536   : > { %v2375_v39 = vpop.f32.mrb[32].mxu0 }
 0x537   : > { %v2505_v59 = vadd.f32 %v2497_v21, %v2375_v39  ;;  %v2421_v40 = vpop.f32.mrb[32].mxu1  ;;  %v3348_v41 = vpop.f32.mrb[33].mxu0 }
 0x538   : > { %v2506_v42 = vadd.f32 %v2498_v33, %v2421_v40  ;;  %v3354_v29 = vpop.f32.mrb[33].mxu1  ;;  %v2378_v14 = vpop.f32.mrb[34].mxu0  ;;  %v2523_v37 = vld [vmem:[#allocation5 + $0x20] sm:$0xff] }
 0x539   : > { %2513 = vst.msk [vmem:[#allocation5 + $0x30] sm:$0xff] %vm754_vm2, %v2505_v59  ;;  %v2424_v15 = vpop.f32.mrb[34].mxu1  ;;  %v3349_v46 = vpop.f32.mrb[35].mxu0  ;;  %v2524_v1 = vld [vmem:[#allocation5 + $0x28] sm:$0xff] }
 0x53a   : > { %2514 = vst.msk [vmem:[#allocation5 + $0x38] sm:$0xff] %vm754_vm2, %v2506_v42  ;;  %v3355_v47 = vpop.f32.mrb[35].mxu1 }
 0x540   : > { %v2525_v2 = vld [vmem:[#allocation5 + $0x30] sm:$0xff] }
 0x541   : > { %v2526_v20 = vld [vmem:[#allocation5 + $0x38] sm:$0xff] }
 0x577   : > { %v2535_v36 = vpop.permute.xlu0 %2534  ;;  %v2542_v48 = vpop.permute.xlu1 %2541 }
 0x578   : > { %v2585_v38 = vmul.f32 %v2535_v36, %v2519_v45  ;;  %v2586_v4 = vmul.f32 %v2542_v48, %v2520_v49 }
 0x57b   : > { %v2549_v50 = vpop.permute.xlu0 %2548  ;;  %v2556_v51 = vpop.permute.xlu1 %2555 }
 0x57c   : > { %v2587_v24 = vmul.f32 %v2549_v50, %v2521_v27  ;;  %v2588_v26 = vmul.f32 %v2556_v51, %v2522_v35  ;;  %v3488_v51 = vld [vmem:[#allocation14] sm:$0xff]  }
 0x57d   : > { %3357 = vmatpush3.bf16.msra.mxu0 %v3488_v51 }
 0x57e   : > { %v2593_v6 = vcombine.low %v2585_v38, %v2587_v24  ;;  %v2594_v10 = vcombine.high %v2585_v38, %v2587_v24  ;;  %v2609_v52 = vcombine.low %v2586_v4, %v2588_v26  ;;  %v2610_v53 = vcombine.high %v2586_v4, %v2588_v26  ;;  %3358 = vmatprep.subr.bf16.mxu0 %v3757_v0 }
 0x57f   : > { %v2563_v56 = vpop.permute.xlu0 %2562  ;;  %v2570_v57 = vpop.permute.xlu1 %2569 }
 0x580   : > { %v2601_v34 = vrot.slane %v2593_v6, %v4121_v25  ;;  %v2608_v58 = vrot.slane %v2594_v10, %v4121_v25  ;;  %v2617_v60 = vrot.slane %v2609_v52, %v4121_v25  ;;  %v2624_v18 = vrot.slane %v2610_v53, %v4121_v25 }
 0x581   : > { %v2589_v9 = vmul.f32 %v2563_v56, %v2523_v37  ;;  %v2590_v54 = vmul.f32 %v2570_v57, %v2524_v1 }
 0x582   : > { %v2657_v44 = vcombine.low %v2601_v34, %v2617_v60  ;;  %v2658_v8 = vcombine.high %v2601_v34, %v2617_v60  ;;  %v2673_v61 = vcombine.low %v2608_v58, %v2624_v18  ;;  %v2674_v28 = vcombine.high %v2608_v58, %v2624_v18  ;;  %v3489_v58 = vld [vmem:[#allocation14 + $0x8] sm:$0xff]  }
 0x583   : > { %v2577_v62 = vpop.permute.xlu0 %2576  ;;  %v2584_v7 = vpop.permute.xlu1 %2583  ;;  %3359 = vmatpush3.bf16.msra.mxu0 %v3489_v58 }
 0x584   : > { %v2665_v17 = vrot.slane %v2657_v44, %v4126_v32  ;;  %v2672_v43 = vrot.slane %v2658_v8, %v4126_v32  ;;  %v2681_v19 = vrot.slane %v2673_v61, %v4126_v32  ;;  %v2688_v63 = vrot.slane %v2674_v28, %v4126_v32 }
 0x585   : > { %v2591_v11 = vmul.f32 %v2577_v62, %v2525_v2  ;;  %v2592_v5 = vmul.f32 %v2584_v7, %v2526_v20 }
 0x586   : > { %v3187_v55 = vcombine.low %v2665_v17, %v2672_v43  ;;  %v3189_v22 = vcombine.high %v2665_v17, %v2672_v43  ;;  %v3191_v3 = vcombine.low %v2681_v19, %v2688_v63  ;;  %v3193_v12 = vcombine.high %v2681_v19, %v2688_v63 }
 0x587   : > { %v2625_v13 = vcombine.low %v2589_v9, %v2591_v11  ;;  %v2626_v16 = vcombine.high %v2589_v9, %v2591_v11  ;;  %v2641_v23 = vcombine.low %v2590_v54, %v2592_v5  ;;  %v2642_v30 = vcombine.high %v2590_v54, %v2592_v5 }
 0x588   : > { %v2737_v31 = vrot.slane %v3187_v55, %v4121_v25  ;;  %v2753_v21 = vrot.slane %v3189_v22, %v4121_v25  ;;  %v2769_v33 = vrot.slane %v3191_v3, %v4121_v25  ;;  %v2785_v39 = vrot.slane %v3193_v12, %v4121_v25 }
 0x589   : > { %v2633_v59 = vrot.slane %v2625_v13, %v4121_v25  ;;  %v2640_v40 = vrot.slane %v2626_v16, %v4121_v25  ;;  %v2649_v41 = vrot.slane %v2641_v23, %v4121_v25  ;;  %v2656_v42 = vrot.slane %v2642_v30, %v4121_v25 }
 0x58a   : > { %v2794_v29 = vcombine.high %v2737_v31, %v2753_v21  ;;  %v2826_v14 = vcombine.high %v2769_v33, %v2785_v39  ;;  %v2793_v15 = vcombine.low %v2737_v31, %v2753_v21  ;;  %v2825_v46 = vcombine.low %v2769_v33, %v2785_v39  ;;  %v3195_v21 = vld [vmem:[%s4642_s5] ss:$0 sm:$0xff] }
 0x58b   : > { %v2689_v47 = vcombine.low %v2633_v59, %v2649_v41  ;;  %v2690_v36 = vcombine.high %v2633_v59, %v2649_v41  ;;  %v2705_v48 = vcombine.low %v2640_v40, %v2656_v42  ;;  %v2706_v45 = vcombine.high %v2640_v40, %v2656_v42 }
 0x58c   : > { %v2808_v49 = vrot.slane %v2794_v29, %v4126_v32  ;;  %v2840_v50 = vrot.slane %v2826_v14, %v4126_v32  ;;  %v2801_v27 = vrot.slane %v2793_v15, %v4126_v32  ;;  %v2833_v35 = vrot.slane %v2825_v46, %v4126_v32 }
 0x58d   : > { %v2697_v38 = vrot.slane %v2689_v47, %v4126_v32  ;;  %v2704_v4 = vrot.slane %v2690_v36, %v4126_v32  ;;  %v2713_v24 = vrot.slane %v2705_v48, %v4126_v32  ;;  %v2720_v26 = vrot.slane %v2706_v45, %v4126_v32 }
 0x58e   : > { %v2859_v6 = vcombine.low %v2808_v49, %v2840_v50  ;;  %v2858_v10 = vcombine.high %v2801_v27, %v2833_v35  ;;  %v2857_v52 = vcombine.low %v2801_v27, %v2833_v35  ;;  %v2860_v61 = vcombine.high %v2808_v49, %v2840_v50 }
 0x58f   : > { %v3188_v53 = vcombine.low %v2697_v38, %v2704_v4  ;;  %v3190_v56 = vcombine.high %v2697_v38, %v2704_v4  ;;  %v3192_v57 = vcombine.low %v2713_v24, %v2720_v26  ;;  %v3194_v34 = vcombine.high %v2713_v24, %v2720_v26 }
 0x590   : > { %2870 = vrot.lane.b32.xlu1 %v2859_v6, %s3770_s14  ;;  %2866 = vrot.lane.b32.xlu0 %v2858_v10, %s3771_s28  ;;  %s3658_s14 = sshll.u32 %s3777_s4, 4  ;;  %s3659_s14 = int_to_ptr.vmem [resolvable:$false] %s3658_s14 }
 0x591   : > { %v2744_v60 = vrot.slane %v3188_v53, %v4121_v25  ;;  %v2760_v18 = vrot.slane %v3190_v56, %v4121_v25  ;;  %v2776_v44 = vrot.slane %v3192_v57, %v4121_v25  ;;  %v2792_v8 = vrot.slane %v3194_v34, %v4121_v25  ;;  %s3660_s28 = scalar_lea.vmem %s3659_s14, 256  ;;  %p3661_p1 = scmp.lt.s32.totalorder %s4589_s21, %s3659_s14 }
 0x592   : > { %p3662_p13 = scmp.lt.s32.totalorder %s3660_s28, %s3654_s13 }
 0x593   : > { %v2809_v28 = vcombine.low %v2744_v60, %v2760_v18  ;;  %v2841_v37 = vcombine.low %v2776_v44, %v2792_v8  ;;  %v2810_v62 = vcombine.high %v2744_v60, %v2760_v18  ;;  %v2842_v7 = vcombine.high %v2776_v44, %v2792_v8 }
 0x594   : > { %2874 = vrot.lane.b32.xlu0 %v2860_v61, %s3772_s11  ;;  %p3663_p3 = por %p3662_p13, %p3661_p1 }
 0x595   : > { %v2817_v0 = vrot.slane %v2809_v28, %v4126_v32  ;;  %v2849_v17 = vrot.slane %v2841_v37, %v4126_v32  ;;  %v2824_v63 = vrot.slane %v2810_v62, %v4126_v32  ;;  %v2856_v1 = vrot.slane %v2842_v7, %v4126_v32 }
 0x596   : > { %p3664_p5 = pnand %p3663_p3, %p3657_p8 }
 0x597   : > { %v2862_v43 = vcombine.high %v2817_v0, %v2849_v17  ;;  %v2861_v19 = vcombine.low %v2817_v0, %v2849_v17  ;;  %v2864_v25 = vcombine.high %v2824_v63, %v2856_v1  ;;  %v2863_v2 = vcombine.low %v2824_v63, %v2856_v1 }
 0x599   : > { %2882 = vrot.lane.b32.xlu0 %v2862_v43, %s3773_s17  ;;  %2878 = vrot.lane.b32.xlu1 %v2861_v19, %s3774_s3 }
 0x59d   : > { %2890 = vrot.lane.b32.xlu0 %v2864_v25, %s3775_s8  ;;  %2886 = vrot.lane.b32.xlu1 %v2863_v2, %s3776_s12 }
 0x602   : > { %v2867_v20 = vpop.permute.xlu0 %2866  ;;  %v2871_v54 = vpop.permute.xlu1 %2870 }
 0x603   : > { %v2893_v11 = vsel %vm754_vm2, %v2857_v52, %v2867_v20 }
 0x604   : > { %v2894_v32 = vsel %vm751_vm4, %v2893_v11, %v2871_v54 }
 0x606   : > { %v2875_v9 = vpop.permute.xlu0 %2874 }
 0x607   : > { %v2896_v5 = vsel %vm2895_vm13, %v2894_v32, %v2875_v9 }
 0x60b   : > { %v2883_v55 = vpop.permute.xlu0 %2882  ;;  %v2879_v22 = vpop.permute.xlu1 %2878 }
 0x60c   : > { %v2898_v3 = vsel %vm2897_vm14, %v2896_v5, %v2879_v22 }
 0x60d   : > { %v2900_v13 = vsel %vm2899_vm15, %v2898_v3, %v2883_v55 }
 0x60f   : > { %v2891_v12 = vpop.permute.xlu0 %2890  ;;  %v2887_v16 = vpop.permute.xlu1 %2886 }
 0x610   : > { %v2902_v23 = vsel %vm2901_vm0, %v2900_v13, %v2887_v16 }
 0x611   : > { %v2904_v30 = vsel %vm2903_vm3, %v2902_v23, %v2891_v12 }
 0x612   : > { %v2905_v31 = vpack.c.bf16 %v2904_v30, %v2904_v30 }
 0x614   : > { %3361 = vmatmul.mubr.msk.bf16.vlgmr.msra.gmra.mrb[36].mxu0 %vm396_vm1, %v2905_v31 }
 0x6e7   : > { %v2966_v33 = vpop.f32.mrb[36].mxu0 }
 0x6e8   : > { %v2967_v39 = vadd.f32 %v3195_v21, %v2966_v33  ;;  %v3362_v59 = vpop.f32.mrb[37].mxu0 }
 0x6e9   : > { %v2969_v40 = vpop.f32.mrb[38].mxu0 }
 0x6ea   : > { %v3363_v41 = vpop.f32.mrb[39].mxu0  ;;  %2972 = vst.msk [vmem:[%s373_s29] sm:$0xff] %vm396_vm1, %v2967_v39 }
 0x6eb   : > { %3667 = shalt.err (!%p3664_p5)
}
 0x6ec   : > { %s3668_s18 = scalar_lea.hbm %s4587_s2, 128  ;;  %s3672_s3 = scalar_lea.hbm %s4643_s6, 256 }
 0x6ed   : > { %p3669_p6 = scmp.ne.s32.totalorder %s4587_s2, %s3668_s18  ;;  %p3673_p7 = scmp.lt.u32.totalorder %s4587_s2, %s4643_s6 }
 0x6ee   : > { %p3674_p11 = scmp.lt.u32.totalorder %s3672_s3, %s3668_s18  ;;  %p3676_p0 = scmp.lt.u32.totalorder %s3668_s18, %s4587_s2 }
 0x6ef   : > { %p3670_p12 = pnand %p3669_p6, %p4672_p2 }
 0x6f0   : > { %p3675_p9 = por %p3674_p11, %p3673_p7 }
 0x6f1   : > { %p3671_p10 = pneg %p3670_p12 }
 0x6f2   : > { %p3677_p4 = por %p3676_p0, %p3675_p9 }
 0x6f4   : > { %p3678_p8 = pnand %p3677_p4, %p3671_p10 }
 0x6f6   : > { %3681 = shalt.err (!%p3678_p8)
}
 0x6f7   : > { %3380 = dma.vmem_to_hbm [thread:$0]  (%p4672_p2), %s4589_s21, 128, %s4587_s2, %s2974_s24  }
 0x6f8 PF: > { %s4673_s9 = sld [smem:[#allocation21_spill]]  ;;  %s4674_s20 = sld [smem:[#allocation22_spill]] }
 0x6f9   : > { %p4676_p13 = scmp.ge.s32.totalorder %s3748_s26, 2 }
 0x6fe   : > { %s3000_s7 = sand.u32 1, %s4673_s9   ;;  %p4675_p1 = scmp.ne.s32.totalorder %s4674_s20, 0 }
 0x6ff   : > { %s3001_s27 = scalar_lea.sflag [#allocation8], %s3000_s7 }
 0x700   : > { %p3400_p3 = pnand %p4676_p13, %p4675_p1 }
 0x702   : > { %3723 = dma.done.wait (!%p3400_p3), %s3001_s27, 128  }
 0x703   : > { %3725 = vsyncadd (!%p3400_p3), %s3001_s27, 4294967168  ;;  %s26_s26 = sadd.s32 1, %s3748_s26   ;;  %s4677_s21 = smov %s3732_s22 }
 0x704   : > { %p23_p5 = scmp.ge.s32.totalorder %s26_s26, 4   ;;  %s4678_s22 = smov %s3736_s23 }
 0x705   : > { %s4679_s23 = smov %s3983_s15  ;;  %s4680_s24 = smov %s3744_s25 }
 0x706   : > { %s4681_s25 = smov %s4683_s10  ;;  %25 = sbr.rel (!%p23_p5) target bundleno = 13 (0xd), region = 122 }
 0x70d   :  { %3006 = vsyncpa [#allocation7], 1 }
 0x70e   :  { %3008 = vsyncpa [#allocation7 + $0x1], 1 }
 0x70f   :  { %3009 = vsyncpa [#allocation10], 1 }
 0x710   :  { %3011 = vsyncpa [#allocation10 + $0x1], 1 }
 0x711   :  { %3012 = vsyncpa [#allocation13], 1 }
 0x712   :  { %3013 = vsyncpa [#allocation8], 1 }
 0x713   :  { %3015 = vsyncpa [#allocation8 + $0x1], 1 }

</bundles_post_ra>
